<compile_context>
chip_gen: v6e
topology: v6e:2x2x1
jax: 0.10.0
libtpu: 0.0.40
codegen_flags: <defaults>
</compile_context>

<pallas_src>
import functools
import math

import jax
import jax.numpy as jnp
from jax import lax
from jax.experimental import pallas as pl
from jax.experimental.pallas import tpu as pltpu

_F32 = jnp.float32
_BF16 = jnp.bfloat16


def _layer_norm(x, gamma, beta, eps=1e-5):
    # two-pass variance (matches nn.LayerNorm; no E[x^2]-mean^2 cancellation)
    mean = jnp.mean(x, axis=-1, keepdims=True)
    c = x - mean
    var = jnp.mean(c * c, axis=-1, keepdims=True)
    return c * lax.rsqrt(var + eps) * gamma + beta


def encoder_layer_kernel(
    x_ref, mask_ref,
    ln1_g, ln1_b, wqkv, bqkv, wo, bo,
    ln2_g, ln2_b, w1, b1, w2, b2,
    out_ref,
    k_cache, v_cache,
    *, n_heads, q_tile, kv_block, dff_chunk,
):
    f32, bf16 = _F32, _BF16
    S, D = x_ref.shape[1], x_ref.shape[2]
    dk = D // n_heads
    d_ff = w1.shape[1]
    qi = pl.program_id(1)

    # ---- once per batch element: project K|V for the full sequence, bias + bf16
    #      immediately, cache in persistent VMEM scratch (qi axis is sequential). ----
    @pl.when(qi == 0)
    def _build_kv_cache():
        xn = _layer_norm(x_ref[0].astype(f32), ln1_g[...], ln1_b[...]).astype(bf16)
        k = jnp.dot(xn, wqkv[:, D:2 * D], preferred_element_type=f32) + bqkv[:, D:2 * D]
        k_cache[...] = k.astype(bf16)
        v = jnp.dot(xn, wqkv[:, 2 * D:], preferred_element_type=f32) + bqkv[:, 2 * D:]
        v_cache[...] = v.astype(bf16)

    # ---------------- sublayer 0: x + SelfAttn(LN1(x)) ----------------
    q_start = pl.multiple_of(qi * q_tile, q_tile)
    x_q = x_ref[0, pl.ds(q_start, q_tile), :].astype(f32)          # [TQ, D]
    xn_q = _layer_norm(x_q, ln1_g[...], ln1_b[...])
    q = jnp.dot(xn_q.astype(bf16), wqkv[:, :D], preferred_element_type=f32) + bqkv[:, :D]
    # fold 1/sqrt(dk) into q once; cast bf16 BEFORE the [TQ, H, dk] reshape
    q3 = (q * (1.0 / math.sqrt(dk))).astype(bf16).reshape(q_tile, n_heads, dk)

    # flash-style online softmax over key blocks (scores bounded to [H, TQ, TK])
    def kv_step(kb_start, carry):
        m_i, l_i, acc = carry
        k_b = k_cache[pl.ds(kb_start, kv_block), :].reshape(kv_block, n_heads, dk)
        v_b = v_cache[pl.ds(kb_start, kv_block), :].reshape(kv_block, n_heads, dk)
        bias = jnp.where(mask_ref[0, 0, pl.ds(kb_start, kv_block)] == 0,
                         -1e9, 0.0).astype(f32)                    # [TK]
        s = jnp.einsum("qhd,khd->hqk", q3, k_b,
                       preferred_element_type=f32) + bias          # [H, TQ, TK]
        m_new = jnp.maximum(m_i, jnp.max(s, axis=-1, keepdims=True))
        alpha = jnp.exp(m_i - m_new)
        p = jnp.exp(s - m_new)
        l_new = alpha * l_i + jnp.sum(p, axis=-1, keepdims=True)
        acc_new = alpha * acc + jnp.einsum("hqk,khd->hqd", p.astype(bf16), v_b,
                                           preferred_element_type=f32)
        return m_new, l_new, acc_new

    m0 = jnp.full((n_heads, q_tile, 1), -1e30, f32)
    l0 = jnp.zeros((n_heads, q_tile, 1), f32)
    a0 = jnp.zeros((n_heads, q_tile, dk), f32)
    n_kb = S // kv_block
    if n_kb == 1:
        m_f, l_f, acc = kv_step(0, (m0, l0, a0))
    else:
        m_f, l_f, acc = lax.fori_loop(
            0, n_kb,
            lambda j, c: kv_step(pl.multiple_of(j * kv_block, kv_block), c),
            (m0, l0, a0))

    ctx = acc / l_f                                                # exact softmax norm
    ctx = jnp.transpose(ctx, (1, 0, 2)).reshape(q_tile, D)
    attn = jnp.dot(ctx.astype(bf16), wo[...], preferred_element_type=f32) + bo[...]
    x1 = x_q + attn                                 # dropout == identity (eval)

    # ---------------- sublayer 1: x + FFN(LN2(x)) ----------------
    xn2 = _layer_norm(x1, ln2_g[...], ln2_b[...]).astype(bf16)

    def ff_chunk(lo, acc2):
        h = jnp.dot(xn2, w1[:, pl.ds(lo, dff_chunk)], preferred_element_type=f32)
        h = jnp.maximum(h + b1[0, pl.ds(lo, dff_chunk)], 0.0)
        return acc2 + jnp.dot(h.astype(bf16), w2[pl.ds(lo, dff_chunk), :],
                              preferred_element_type=f32)

    acc2 = x1 + b2[...]                             # residual + final bias folded in
    n_ff = d_ff // dff_chunk
    if n_ff == 1:
        acc2 = ff_chunk(0, acc2)
    else:
        acc2 = lax.fori_loop(
            0, n_ff,
            lambda i, a: ff_chunk(pl.multiple_of(i * dff_chunk, dff_chunk), a),
            acc2, unroll=True)

    out_ref[0] = acc2.astype(out_ref.dtype)


def prepare_encoder_params(p, compute_dtype=_BF16):
    """One-time (init-time) weight fusion + cast; do NOT call per forward pass."""
    return {
        "ln1_g": p["ln1_g"].astype(_F32), "ln1_b": p["ln1_b"].astype(_F32),
        "wqkv": jnp.concatenate([p["wq"], p["wk"], p["wv"]], axis=1).astype(compute_dtype),
        "bqkv": jnp.concatenate([p["bq"], p["bk"], p["bv"]], axis=1).astype(_F32),
        "wo": p["wo"].astype(compute_dtype), "bo": p["bo"].astype(_F32),
        "ln2_g": p["ln2_g"].astype(_F32), "ln2_b": p["ln2_b"].astype(_F32),
        "w1": p["w1"].astype(compute_dtype), "b1": p["b1"].astype(_F32),
        "w2": p["w2"].astype(compute_dtype), "b2": p["b2"].astype(_F32),
    }


def _vmem_capacity_bytes():
    try:
        cap = int(pltpu.get_tpu_info().vmem_capacity_bytes)
        if cap > 0:
            return cap
    except Exception:
        pass
    return 128 * 1024 * 1024            # v5e / v6e default (also interpret fallback)


def _pick_tiles(S, d_ff, vmem_cap):
    small_vmem = vmem_cap <= 64 * 1024 * 1024            # v7x: tighter tiles
    q_tile = S
    for cand in ((128,) if small_vmem else (256, 128)):
        if S > cand and S % cand == 0:
            q_tile = cand
            break
    kv_block = S
    for cand in ((512,) if small_vmem else (1024, 512)):
        if S > cand and S % cand == 0:
            kv_block = cand
            break
    dff_chunk = d_ff
    for cand in ((512,) if small_vmem else (2048, 1024)):
        if d_ff > cand and d_ff % cand == 0:
            dff_chunk = cand
            break
    return q_tile, kv_block, dff_chunk


def encoder_layer_pallas(x, mask, params, n_heads, *,
                         q_tile=None, kv_block=None, dff_chunk=None):
    B, S, D = x.shape
    d_ff = params["w1"].shape[1]
    vmem_cap = _vmem_capacity_bytes()
    auto_q, auto_kv, auto_ff = _pick_tiles(S, d_ff, vmem_cap)
    q_tile = q_tile or auto_q
    kv_block = kv_block or auto_kv
    dff_chunk = dff_chunk or auto_ff
    assert S % q_tile == 0 and S % kv_block == 0 and d_ff % dff_chunk == 0

    kernel = functools.partial(encoder_layer_kernel, n_heads=n_heads,
                               q_tile=q_tile, kv_block=kv_block, dff_chunk=dff_chunk)

    # Weights / biases / LN params: whole-array, resident in VMEM for the entire call
    # (single copy, fetched once, no per-grid-step double buffering).
    wspec = pl.BlockSpec(memory_space=pltpu.MemorySpace.VMEM)

    in_specs = [
        pl.BlockSpec((1, S, D), lambda b, qi: (b, 0, 0)),   # x: full seq per batch; query tile sliced in-kernel
        pl.BlockSpec((1, 1, S), lambda b, qi: (b, 0, 0)),   # mask
        wspec, wspec,                                       # ln1 gamma / beta
        wspec, wspec,                                       # wqkv, bqkv
        wspec, wspec,                                       # wo, bo
        wspec, wspec,                                       # ln2 gamma / beta
        wspec, wspec,                                       # w1, b1
        wspec, wspec,                                       # w2, b2
    ]
    out_spec = pl.BlockSpec((1, q_tile, D), lambda b, qi: (b, qi, 0))

    # ~48 MiB on v7x (64 MiB physical), up to 100 MiB on v5e/v6e (128 MiB).
    vmem_limit = min(vmem_cap - 16 * 1024 * 1024, 100 * 1024 * 1024)

    return pl.pallas_call(
        kernel,
        out_shape=jax.ShapeDtypeStruct((B, S, D), x.dtype),
        grid=(B, S // q_tile),
        in_specs=in_specs,
        out_specs=out_spec,
        scratch_shapes=[pltpu.VMEM((S, D), _BF16),   # cached projected K (bias folded, bf16)
                        pltpu.VMEM((S, D), _BF16)],  # cached projected V
        compiler_params=pltpu.CompilerParams(
            # K/V cache persists across query tiles -> qi sequential ("arbitrary");
            # batch stays "parallel" so v7x megacore still splits over batch.
            dimension_semantics=("parallel", "arbitrary"),
            vmem_limit_bytes=vmem_limit),
    )(x, mask,
      params["ln1_g"], params["ln1_b"], params["wqkv"], params["bqkv"],
      params["wo"], params["bo"],
      params["ln2_g"], params["ln2_b"], params["w1"], params["b1"],
      params["w2"], params["b2"])


def reference_encoder_layer(x, mask, p, n_heads, eps=1e-5):
    """Pure-JAX f32 reference matching the PyTorch forward (eval mode)."""
    def ln(t, g, b):
        m = jnp.mean(t, -1, keepdims=True)
        v = jnp.mean((t - m) ** 2, -1, keepdims=True)
        return (t - m) / jnp.sqrt(v + eps) * g + b

    B, S, D = x.shape
    dk = D // n_heads
    xn = ln(x, p["ln1_g"], p["ln1_b"])
    q = xn @ p["wq"] + p["bq"]
    k = xn @ p["wk"] + p["bk"]
    v = xn @ p["wv"] + p["bv"]
    qh = q.reshape(B, S, n_heads, dk).transpose(0, 2, 1, 3)
    kh = k.reshape(B, S, n_heads, dk).transpose(0, 2, 1, 3)
    vh = v.reshape(B, S, n_heads, dk).transpose(0, 2, 1, 3)
    scores = jnp.einsum("bhqd,bhkd->bhqk", qh, kh) / math.sqrt(dk)
    m = mask[:, None, :, :]                      # [B,1,1,S]
    scores = jnp.where(m == 0, -1e9, scores)
    pa = jax.nn.softmax(scores, axis=-1)
    o = jnp.einsum("bhqk,bhkd->bhqd", pa, vh).transpose(0, 2, 1, 3).reshape(B, S, D)
    x1 = x + o @ p["wo"] + p["bo"]
    xn2 = ln(x1, p["ln2_g"], p["ln2_b"])
    h = jax.nn.relu(xn2 @ p["w1"] + p["b1"])
    return x1 + h @ p["w2"] + p["b2"]


if __name__ == "__main__":
    B, S, D, H, D_FF = 2, 8, 32, 4, 64
    # TODO(synk): for real benchmarking use tile-aligned shapes (D, d_ff multiples of
    # 128; S multiple of the query/kv tiles) -- the toy config is partial-vreg work.

    key = jax.random.PRNGKey(0)
    ks = jax.random.split(key, 16)

    def init(k, shape, scale=0.05):
        return jax.random.normal(k, shape, jnp.float32) * scale

    raw_params = {
        "ln1_g": jnp.ones((1, D), jnp.float32),
        "ln1_b": jnp.zeros((1, D), jnp.float32),
        "wq": init(ks[0], (D, D)), "bq": init(ks[1], (1, D)),
        "wk": init(ks[2], (D, D)), "bk": init(ks[3], (1, D)),
        "wv": init(ks[4], (D, D)), "bv": init(ks[5], (1, D)),
        "wo": init(ks[6], (D, D)), "bo": init(ks[7], (1, D)),
        "ln2_g": jnp.ones((1, D), jnp.float32),
        "ln2_b": jnp.zeros((1, D), jnp.float32),
        "w1": init(ks[8], (D, D_FF)), "b1": init(ks[9], (1, D_FF)),
        "w2": init(ks[10], (D_FF, D)), "b2": init(ks[11], (1, D)),
    }
    prepared = prepare_encoder_params(raw_params)   # one-time init-time fusion/cast

    x = jax.random.normal(ks[12], (B, S, D), jnp.float32)
    mask = jnp.ones((B, 1, S), jnp.int32)
    mask = mask.at[1, 0, S - 2:].set(0)             # mask out last 2 keys of batch 1

    out = jax.block_until_ready(encoder_layer_pallas(x, mask, prepared, n_heads=H))
    ref = reference_encoder_layer(x, mask, raw_params, n_heads=H)

    assert out.shape == (B, S, D)
    err = float(jnp.max(jnp.abs(out - ref)))
    # bf16 matmul operands (f32 accumulation) -> bf16-level tolerance
    assert err < 2e-2, f"mismatch vs JAX reference (max abs err {err})"

    print("KERNEL_OK")
</pallas_src>

<mosaic_0001>
module attributes {stable_mosaic.version = 11 : i64} {
  func.func @encoder_layer_kernel(%arg0: i32, %arg1: i32, %arg2: memref<1x8x32xf32, #tpu.memory_space<vmem>>, %arg3: memref<1x1x8xi32, #tpu.memory_space<vmem>>, %arg4: memref<1x32xf32, #tpu.memory_space<vmem>>, %arg5: memref<1x32xf32, #tpu.memory_space<vmem>>, %arg6: memref<32x96xbf16, #tpu.memory_space<vmem>>, %arg7: memref<1x96xf32, #tpu.memory_space<vmem>>, %arg8: memref<32x32xbf16, #tpu.memory_space<vmem>>, %arg9: memref<1x32xf32, #tpu.memory_space<vmem>>, %arg10: memref<1x32xf32, #tpu.memory_space<vmem>>, %arg11: memref<1x32xf32, #tpu.memory_space<vmem>>, %arg12: memref<32x64xbf16, #tpu.memory_space<vmem>>, %arg13: memref<1x64xf32, #tpu.memory_space<vmem>>, %arg14: memref<64x32xbf16, #tpu.memory_space<vmem>>, %arg15: memref<1x32xf32, #tpu.memory_space<vmem>>, %arg16: memref<1x8x32xf32, #tpu.memory_space<vmem>>, %arg17: memref<8x32xbf16, #tpu.memory_space<vmem>>, %arg18: memref<8x32xbf16, #tpu.memory_space<vmem>>) attributes {dimension_semantics = [#tpu.dimension_semantics<parallel>, #tpu.dimension_semantics<arbitrary>], iteration_bounds = array<i64: 2, 1>, scalar_prefetch = 0 : i64, scratch_operands = 2 : i64, tpu.core_type = #tpu.core_type<tc>, window_params = [{transform_indices = @transform_0, window_bounds = array<i64: 1, 8, 32>}, {transform_indices = @transform_1, window_bounds = array<i64: 1, 1, 8>}, {pipeline_mode = #tpu.pipeline_mode<synchronous>, transform_indices = @transform_2, window_bounds = array<i64: 1, 32>}, {pipeline_mode = #tpu.pipeline_mode<synchronous>, transform_indices = @transform_3, window_bounds = array<i64: 1, 32>}, {pipeline_mode = #tpu.pipeline_mode<synchronous>, transform_indices = @transform_4, window_bounds = array<i64: 32, 96>}, {pipeline_mode = #tpu.pipeline_mode<synchronous>, transform_indices = @transform_5, window_bounds = array<i64: 1, 96>}, {pipeline_mode = #tpu.pipeline_mode<synchronous>, transform_indices = @transform_6, window_bounds = array<i64: 32, 32>}, {pipeline_mode = #tpu.pipeline_mode<synchronous>, transform_indices = @transform_7, window_bounds = array<i64: 1, 32>}, {pipeline_mode = #tpu.pipeline_mode<synchronous>, transform_indices = @transform_8, window_bounds = array<i64: 1, 32>}, {pipeline_mode = #tpu.pipeline_mode<synchronous>, transform_indices = @transform_9, window_bounds = array<i64: 1, 32>}, {pipeline_mode = #tpu.pipeline_mode<synchronous>, transform_indices = @transform_10, window_bounds = array<i64: 32, 64>}, {pipeline_mode = #tpu.pipeline_mode<synchronous>, transform_indices = @transform_11, window_bounds = array<i64: 1, 64>}, {pipeline_mode = #tpu.pipeline_mode<synchronous>, transform_indices = @transform_12, window_bounds = array<i64: 64, 32>}, {pipeline_mode = #tpu.pipeline_mode<synchronous>, transform_indices = @transform_13, window_bounds = array<i64: 1, 32>}, {transform_indices = @transform_14, window_bounds = array<i64: 1, 8, 32>}]} {
    %c0_i32 = arith.constant 0 : i32
    %0 = arith.cmpi eq, %arg1, %c0_i32 : i32
    %1 = arith.extui %0 : i1 to i32
    %c0_i32_0 = arith.constant 0 : i32
    %2 = arith.cmpi ne, %1, %c0_i32_0 : i32
    scf.if %2 {
      %c0_61 = arith.constant 0 : index
      %c0_62 = arith.constant 0 : index
      %c0_63 = arith.constant 0 : index
      %128 = vector.load %arg2[%c0_61, %c0_62, %c0_63] : memref<1x8x32xf32, #tpu.memory_space<vmem>>, vector<1x8x32xf32>
      %129 = vector.shape_cast %128 : vector<1x8x32xf32> to vector<8x32xf32>
      %c0_64 = arith.constant 0 : index
      %c0_65 = arith.constant 0 : index
      %130 = vector.load %arg4[%c0_64, %c0_65] : memref<1x32xf32, #tpu.memory_space<vmem>>, vector<1x32xf32>
      %c0_66 = arith.constant 0 : index
      %c0_67 = arith.constant 0 : index
      %131 = vector.load %arg5[%c0_66, %c0_67] : memref<1x32xf32, #tpu.memory_space<vmem>>, vector<1x32xf32>
      %cst_68 = arith.constant dense<0.000000e+00> : vector<8xf32>
      %132 = vector.multi_reduction <add>, %129, %cst_68 [1] : vector<8x32xf32> to vector<8xf32>
      %133 = vector.shape_cast %132 : vector<8xf32> to vector<8x1xf32>
      %cst_69 = arith.constant 3.200000e+01 : f32
      %134 = vector.broadcast %cst_69 : f32 to vector<8x1xf32>
      %135 = arith.divf %133, %134 : vector<8x1xf32>
      %136 = vector.broadcast %135 : vector<8x1xf32> to vector<8x32xf32>
      %137 = arith.subf %129, %136 : vector<8x32xf32>
      %138 = arith.mulf %137, %137 : vector<8x32xf32>
      %cst_70 = arith.constant dense<0.000000e+00> : vector<8xf32>
      %139 = vector.multi_reduction <add>, %138, %cst_70 [1] : vector<8x32xf32> to vector<8xf32>
      %140 = vector.shape_cast %139 : vector<8xf32> to vector<8x1xf32>
      %cst_71 = arith.constant 3.200000e+01 : f32
      %141 = vector.broadcast %cst_71 : f32 to vector<8x1xf32>
      %142 = arith.divf %140, %141 : vector<8x1xf32>
      %cst_72 = arith.constant 9.99999974E-6 : f32
      %143 = vector.broadcast %cst_72 : f32 to vector<8x1xf32>
      %144 = arith.addf %142, %143 : vector<8x1xf32>
      %145 = math.rsqrt %144 : vector<8x1xf32>
      %146 = vector.broadcast %145 : vector<8x1xf32> to vector<8x32xf32>
      %147 = arith.mulf %137, %146 : vector<8x32xf32>
      %148 = vector.broadcast %130 : vector<1x32xf32> to vector<8x32xf32>
      %149 = arith.mulf %147, %148 : vector<8x32xf32>
      %150 = vector.broadcast %131 : vector<1x32xf32> to vector<8x32xf32>
      %151 = arith.addf %149, %150 : vector<8x32xf32>
      %152 = arith.truncf %151 : vector<8x32xf32> to vector<8x32xbf16>
      %c0_73 = arith.constant 0 : index
      %c32 = arith.constant 32 : index
      %153 = vector.load %arg6[%c0_73, %c32] : memref<32x96xbf16, #tpu.memory_space<vmem>>, vector<32x32xbf16>
      %cst_74 = arith.constant dense<0.000000e+00> : vector<8x32xf32>
      %154 = tpu.matmul %152, %153, %cst_74 {dimension_numbers = #tpu.dot_dimension_numbers<[1], [0], [0], [1], [0, 0, 1, 1], [], []>} : vector<8x32xbf16>, vector<32x32xbf16>, vector<8x32xf32> -> vector<8x32xf32>
      %c0_75 = arith.constant 0 : index
      %c32_76 = arith.constant 32 : index
      %155 = vector.load %arg7[%c0_75, %c32_76] : memref<1x96xf32, #tpu.memory_space<vmem>>, vector<1x32xf32>
      %156 = vector.broadcast %155 : vector<1x32xf32> to vector<8x32xf32>
      %157 = arith.addf %154, %156 : vector<8x32xf32>
      %158 = arith.truncf %157 : vector<8x32xf32> to vector<8x32xbf16>
      %c0_77 = arith.constant 0 : index
      %c0_78 = arith.constant 0 : index
      %159 = vector.load %arg17[%c0_77, %c0_78] : memref<8x32xbf16, #tpu.memory_space<vmem>>, vector<8x32xbf16>
      tpu.vector_store %arg17[%c0_77, %c0_78], %158 {strides = array<i32>} : memref<8x32xbf16, #tpu.memory_space<vmem>>, vector<8x32xbf16>,
      %c0_79 = arith.constant 0 : index
      %c64 = arith.constant 64 : index
      %160 = vector.load %arg6[%c0_79, %c64] : memref<32x96xbf16, #tpu.memory_space<vmem>>, vector<32x32xbf16>
      %cst_80 = arith.constant dense<0.000000e+00> : vector<8x32xf32>
      %161 = tpu.matmul %152, %160, %cst_80 {dimension_numbers = #tpu.dot_dimension_numbers<[1], [0], [0], [1], [0, 0, 1, 1], [], []>} : vector<8x32xbf16>, vector<32x32xbf16>, vector<8x32xf32> -> vector<8x32xf32>
      %c0_81 = arith.constant 0 : index
      %c64_82 = arith.constant 64 : index
      %162 = vector.load %arg7[%c0_81, %c64_82] : memref<1x96xf32, #tpu.memory_space<vmem>>, vector<1x32xf32>
      %163 = vector.broadcast %162 : vector<1x32xf32> to vector<8x32xf32>
      %164 = arith.addf %161, %163 : vector<8x32xf32>
      %165 = arith.truncf %164 : vector<8x32xf32> to vector<8x32xbf16>
      %c0_83 = arith.constant 0 : index
      %c0_84 = arith.constant 0 : index
      %166 = vector.load %arg18[%c0_83, %c0_84] : memref<8x32xbf16, #tpu.memory_space<vmem>>, vector<8x32xbf16>
      tpu.vector_store %arg18[%c0_83, %c0_84], %165 {strides = array<i32>} : memref<8x32xbf16, #tpu.memory_space<vmem>>, vector<8x32xbf16>,
    } else {
    }
    %c8_i32 = arith.constant 8 : i32
    %3 = arith.muli %arg1, %c8_i32 : i32
    %4 = tpu.assume_multiple %3, 8 : i32
    %c0 = arith.constant 0 : index
    %5 = arith.index_cast %4 : i32 to index
    %c0_1 = arith.constant 0 : index
    %6 = vector.load %arg2[%c0, %5, %c0_1] : memref<1x8x32xf32, #tpu.memory_space<vmem>>, vector<1x8x32xf32>
    %7 = vector.shape_cast %6 : vector<1x8x32xf32> to vector<8x32xf32>
    %c0_2 = arith.constant 0 : index
    %c0_3 = arith.constant 0 : index
    %8 = vector.load %arg4[%c0_2, %c0_3] : memref<1x32xf32, #tpu.memory_space<vmem>>, vector<1x32xf32>
    %c0_4 = arith.constant 0 : index
    %c0_5 = arith.constant 0 : index
    %9 = vector.load %arg5[%c0_4, %c0_5] : memref<1x32xf32, #tpu.memory_space<vmem>>, vector<1x32xf32>
    %cst = arith.constant dense<0.000000e+00> : vector<8xf32>
    %10 = vector.multi_reduction <add>, %7, %cst [1] : vector<8x32xf32> to vector<8xf32>
    %11 = vector.shape_cast %10 : vector<8xf32> to vector<8x1xf32>
    %cst_6 = arith.constant 3.200000e+01 : f32
    %12 = vector.broadcast %cst_6 : f32 to vector<8x1xf32>
    %13 = arith.divf %11, %12 : vector<8x1xf32>
    %14 = vector.broadcast %13 : vector<8x1xf32> to vector<8x32xf32>
    %15 = arith.subf %7, %14 : vector<8x32xf32>
    %16 = arith.mulf %15, %15 : vector<8x32xf32>
    %cst_7 = arith.constant dense<0.000000e+00> : vector<8xf32>
    %17 = vector.multi_reduction <add>, %16, %cst_7 [1] : vector<8x32xf32> to vector<8xf32>
    %18 = vector.shape_cast %17 : vector<8xf32> to vector<8x1xf32>
    %cst_8 = arith.constant 3.200000e+01 : f32
    %19 = vector.broadcast %cst_8 : f32 to vector<8x1xf32>
    %20 = arith.divf %18, %19 : vector<8x1xf32>
    %cst_9 = arith.constant 9.99999974E-6 : f32
    %21 = vector.broadcast %cst_9 : f32 to vector<8x1xf32>
    %22 = arith.addf %20, %21 : vector<8x1xf32>
    %23 = math.rsqrt %22 : vector<8x1xf32>
    %24 = vector.broadcast %23 : vector<8x1xf32> to vector<8x32xf32>
    %25 = arith.mulf %15, %24 : vector<8x32xf32>
    %26 = vector.broadcast %8 : vector<1x32xf32> to vector<8x32xf32>
    %27 = arith.mulf %25, %26 : vector<8x32xf32>
    %28 = vector.broadcast %9 : vector<1x32xf32> to vector<8x32xf32>
    %29 = arith.addf %27, %28 : vector<8x32xf32>
    %30 = arith.truncf %29 : vector<8x32xf32> to vector<8x32xbf16>
    %c0_10 = arith.constant 0 : index
    %c0_11 = arith.constant 0 : index
    %31 = vector.load %arg6[%c0_10, %c0_11] : memref<32x96xbf16, #tpu.memory_space<vmem>>, vector<32x32xbf16>
    %cst_12 = arith.constant dense<0.000000e+00> : vector<8x32xf32>
    %32 = tpu.matmul %30, %31, %cst_12 {dimension_numbers = #tpu.dot_dimension_numbers<[1], [0], [0], [1], [0, 0, 1, 1], [], []>} : vector<8x32xbf16>, vector<32x32xbf16>, vector<8x32xf32> -> vector<8x32xf32>
    %c0_13 = arith.constant 0 : index
    %c0_14 = arith.constant 0 : index
    %33 = vector.load %arg7[%c0_13, %c0_14] : memref<1x96xf32, #tpu.memory_space<vmem>>, vector<1x32xf32>
    %34 = vector.broadcast %33 : vector<1x32xf32> to vector<8x32xf32>
    %35 = arith.addf %32, %34 : vector<8x32xf32>
    %cst_15 = arith.constant 0.353553385 : f32
    %36 = vector.broadcast %cst_15 : f32 to vector<8x32xf32>
    %37 = arith.mulf %35, %36 : vector<8x32xf32>
    %38 = arith.truncf %37 : vector<8x32xf32> to vector<8x32xbf16>
    %39 = vector.shape_cast %38 : vector<8x32xbf16> to vector<8x4x8xbf16>
    %cst_16 = arith.constant -1.000000e+30 : f32
    %40 = vector.broadcast %cst_16 : f32 to vector<4x8x1xf32>
    %cst_17 = arith.constant 0.000000e+00 : f32
    %41 = vector.broadcast %cst_17 : f32 to vector<4x8x1xf32>
    %cst_18 = arith.constant 0.000000e+00 : f32
    %42 = vector.broadcast %cst_18 : f32 to vector<4x8x8xf32>
    %c0_19 = arith.constant 0 : index
    %c0_20 = arith.constant 0 : index
    %43 = vector.load %arg17[%c0_19, %c0_20] : memref<8x32xbf16, #tpu.memory_space<vmem>>, vector<8x32xbf16>
    %44 = vector.shape_cast %43 : vector<8x32xbf16> to vector<8x4x8xbf16>
    %c0_21 = arith.constant 0 : index
    %c0_22 = arith.constant 0 : index
    %45 = vector.load %arg18[%c0_21, %c0_22] : memref<8x32xbf16, #tpu.memory_space<vmem>>, vector<8x32xbf16>
    %46 = vector.shape_cast %45 : vector<8x32xbf16> to vector<8x4x8xbf16>
    %c0_23 = arith.constant 0 : index
    %c0_24 = arith.constant 0 : index
    %c0_25 = arith.constant 0 : index
    %47 = vector.load %arg3[%c0_23, %c0_24, %c0_25] : memref<1x1x8xi32, #tpu.memory_space<vmem>>, vector<1x1x8xi32>
    %48 = vector.shape_cast %47 : vector<1x1x8xi32> to vector<8xi32>
    %c0_i32_26 = arith.constant 0 : i32
    %49 = vector.broadcast %c0_i32_26 : i32 to vector<8xi32>
    %50 = arith.cmpi eq, %48, %49 : vector<8xi32>
    %cst_27 = arith.constant -1.000000e+09 : f32
    %cst_28 = arith.constant 0.000000e+00 : f32
    %51 = vector.broadcast %cst_27 : f32 to vector<8xf32>
    %52 = vector.broadcast %cst_28 : f32 to vector<8xf32>
    %53 = arith.select %50, %51, %52 : vector<8xi1>, vector<8xf32>
    "tpu.trace_start"() <{level = 10 : i32, message = "qhd,khd->hqk"}> : () -> ()
    %cst_29 = arith.constant dense<0.000000e+00> : vector<4x8x8xf32>
    %54 = tpu.matmul %39, %44, %cst_29 {dimension_numbers = #tpu.dot_dimension_numbers<[2], [2], [0], [0], [0, 1, 0, 0, 1, 0], [1], [1]>} : vector<8x4x8xbf16>, vector<8x4x8xbf16>, vector<4x8x8xf32> -> vector<4x8x8xf32>
    "tpu.trace_stop"() : () -> ()
    %55 = vector.shape_cast %53 : vector<8xf32> to vector<1x1x8xf32>
    %56 = vector.broadcast %55 : vector<1x1x8xf32> to vector<4x8x8xf32>
    %57 = arith.addf %54, %56 : vector<4x8x8xf32>
    %cst_30 = arith.constant dense<0xFF800000> : vector<4x8xf32>
    %58 = vector.multi_reduction <maximumf>, %57, %cst_30 [2] : vector<4x8x8xf32> to vector<4x8xf32>
    %59 = vector.shape_cast %58 : vector<4x8xf32> to vector<4x8x1xf32>
    %60 = arith.maximumf %40, %59 : vector<4x8x1xf32>
    %61 = arith.subf %40, %60 : vector<4x8x1xf32>
    %62 = math.exp %61 : vector<4x8x1xf32>
    %63 = vector.broadcast %60 : vector<4x8x1xf32> to vector<4x8x8xf32>
    %64 = arith.subf %57, %63 : vector<4x8x8xf32>
    %65 = math.exp %64 : vector<4x8x8xf32>
    %66 = arith.mulf %62, %41 : vector<4x8x1xf32>
    %cst_31 = arith.constant dense<0.000000e+00> : vector<4x8xf32>
    %67 = vector.multi_reduction <add>, %65, %cst_31 [2] : vector<4x8x8xf32> to vector<4x8xf32>
    %68 = vector.shape_cast %67 : vector<4x8xf32> to vector<4x8x1xf32>
    %69 = arith.addf %66, %68 : vector<4x8x1xf32>
    %70 = vector.broadcast %62 : vector<4x8x1xf32> to vector<4x8x8xf32>
    %71 = arith.mulf %70, %42 : vector<4x8x8xf32>
    %72 = arith.truncf %65 : vector<4x8x8xf32> to vector<4x8x8xbf16>
    "tpu.trace_start"() <{level = 10 : i32, message = "hqk,khd->hqd"}> : () -> ()
    %cst_32 = arith.constant dense<0.000000e+00> : vector<4x8x8xf32>
    %73 = tpu.matmul %72, %46, %cst_32 {dimension_numbers = #tpu.dot_dimension_numbers<[2], [0], [1], [2], [0, 0, 0, 1, 1, 2], [0], [1]>} : vector<4x8x8xbf16>, vector<8x4x8xbf16>, vector<4x8x8xf32> -> vector<4x8x8xf32>
    "tpu.trace_stop"() : () -> ()
    %74 = arith.addf %71, %73 : vector<4x8x8xf32>
    %75 = vector.broadcast %69 : vector<4x8x1xf32> to vector<4x8x8xf32>
    %76 = arith.divf %74, %75 : vector<4x8x8xf32>
    %77 = tpu.transpose %76, [1, 0, 2] : vector<4x8x8xf32> -> vector<8x4x8xf32>
    %78 = vector.shape_cast %77 : vector<8x4x8xf32> to vector<8x32xf32>
    %79 = arith.truncf %78 : vector<8x32xf32> to vector<8x32xbf16>
    %c0_33 = arith.constant 0 : index
    %c0_34 = arith.constant 0 : index
    %80 = vector.load %arg8[%c0_33, %c0_34] : memref<32x32xbf16, #tpu.memory_space<vmem>>, vector<32x32xbf16>
    %cst_35 = arith.constant dense<0.000000e+00> : vector<8x32xf32>
    %81 = tpu.matmul %79, %80, %cst_35 {dimension_numbers = #tpu.dot_dimension_numbers<[1], [0], [0], [1], [0, 0, 1, 1], [], []>} : vector<8x32xbf16>, vector<32x32xbf16>, vector<8x32xf32> -> vector<8x32xf32>
    %c0_36 = arith.constant 0 : index
    %c0_37 = arith.constant 0 : index
    %82 = vector.load %arg9[%c0_36, %c0_37] : memref<1x32xf32, #tpu.memory_space<vmem>>, vector<1x32xf32>
    %83 = vector.broadcast %82 : vector<1x32xf32> to vector<8x32xf32>
    %84 = arith.addf %81, %83 : vector<8x32xf32>
    %85 = arith.addf %7, %84 : vector<8x32xf32>
    %c0_38 = arith.constant 0 : index
    %c0_39 = arith.constant 0 : index
    %86 = vector.load %arg10[%c0_38, %c0_39] : memref<1x32xf32, #tpu.memory_space<vmem>>, vector<1x32xf32>
    %c0_40 = arith.constant 0 : index
    %c0_41 = arith.constant 0 : index
    %87 = vector.load %arg11[%c0_40, %c0_41] : memref<1x32xf32, #tpu.memory_space<vmem>>, vector<1x32xf32>
    %cst_42 = arith.constant dense<0.000000e+00> : vector<8xf32>
    %88 = vector.multi_reduction <add>, %85, %cst_42 [1] : vector<8x32xf32> to vector<8xf32>
    %89 = vector.shape_cast %88 : vector<8xf32> to vector<8x1xf32>
    %cst_43 = arith.constant 3.200000e+01 : f32
    %90 = vector.broadcast %cst_43 : f32 to vector<8x1xf32>
    %91 = arith.divf %89, %90 : vector<8x1xf32>
    %92 = vector.broadcast %91 : vector<8x1xf32> to vector<8x32xf32>
    %93 = arith.subf %85, %92 : vector<8x32xf32>
    %94 = arith.mulf %93, %93 : vector<8x32xf32>
    %cst_44 = arith.constant dense<0.000000e+00> : vector<8xf32>
    %95 = vector.multi_reduction <add>, %94, %cst_44 [1] : vector<8x32xf32> to vector<8xf32>
    %96 = vector.shape_cast %95 : vector<8xf32> to vector<8x1xf32>
    %cst_45 = arith.constant 3.200000e+01 : f32
    %97 = vector.broadcast %cst_45 : f32 to vector<8x1xf32>
    %98 = arith.divf %96, %97 : vector<8x1xf32>
    %cst_46 = arith.constant 9.99999974E-6 : f32
    %99 = vector.broadcast %cst_46 : f32 to vector<8x1xf32>
    %100 = arith.addf %98, %99 : vector<8x1xf32>
    %101 = math.rsqrt %100 : vector<8x1xf32>
    %102 = vector.broadcast %101 : vector<8x1xf32> to vector<8x32xf32>
    %103 = arith.mulf %93, %102 : vector<8x32xf32>
    %104 = vector.broadcast %86 : vector<1x32xf32> to vector<8x32xf32>
    %105 = arith.mulf %103, %104 : vector<8x32xf32>
    %106 = vector.broadcast %87 : vector<1x32xf32> to vector<8x32xf32>
    %107 = arith.addf %105, %106 : vector<8x32xf32>
    %108 = arith.truncf %107 : vector<8x32xf32> to vector<8x32xbf16>
    %c0_47 = arith.constant 0 : index
    %c0_48 = arith.constant 0 : index
    %109 = vector.load %arg15[%c0_47, %c0_48] : memref<1x32xf32, #tpu.memory_space<vmem>>, vector<1x32xf32>
    %110 = vector.broadcast %109 : vector<1x32xf32> to vector<8x32xf32>
    %111 = arith.addf %85, %110 : vector<8x32xf32>
    %c0_49 = arith.constant 0 : index
    %c0_50 = arith.constant 0 : index
    %112 = vector.load %arg12[%c0_49, %c0_50] : memref<32x64xbf16, #tpu.memory_space<vmem>>, vector<32x64xbf16>
    %cst_51 = arith.constant dense<0.000000e+00> : vector<8x64xf32>
    %113 = tpu.matmul %108, %112, %cst_51 {dimension_numbers = #tpu.dot_dimension_numbers<[1], [0], [0], [1], [0, 0, 1, 1], [], []>} : vector<8x32xbf16>, vector<32x64xbf16>, vector<8x64xf32> -> vector<8x64xf32>
    %c0_52 = arith.constant 0 : index
    %c0_53 = arith.constant 0 : index
    %114 = vector.load %arg13[%c0_52, %c0_53] : memref<1x64xf32, #tpu.memory_space<vmem>>, vector<1x64xf32>
    %115 = vector.shape_cast %114 : vector<1x64xf32> to vector<64xf32>
    %116 = vector.shape_cast %115 : vector<64xf32> to vector<1x64xf32>
    %117 = vector.broadcast %116 : vector<1x64xf32> to vector<8x64xf32>
    %118 = arith.addf %113, %117 : vector<8x64xf32>
    %cst_54 = arith.constant 0.000000e+00 : f32
    %119 = vector.broadcast %cst_54 : f32 to vector<8x64xf32>
    %120 = arith.maximumf %118, %119 : vector<8x64xf32>
    %121 = arith.truncf %120 : vector<8x64xf32> to vector<8x64xbf16>
    %c0_55 = arith.constant 0 : index
    %c0_56 = arith.constant 0 : index
    %122 = vector.load %arg14[%c0_55, %c0_56] : memref<64x32xbf16, #tpu.memory_space<vmem>>, vector<64x32xbf16>
    %cst_57 = arith.constant dense<0.000000e+00> : vector<8x32xf32>
    %123 = tpu.matmul %121, %122, %cst_57 {dimension_numbers = #tpu.dot_dimension_numbers<[1], [0], [0], [1], [0, 0, 1, 1], [], []>} : vector<8x64xbf16>, vector<64x32xbf16>, vector<8x32xf32> -> vector<8x32xf32>
    %124 = arith.addf %111, %123 : vector<8x32xf32>
    %c0_58 = arith.constant 0 : index
    %c0_59 = arith.constant 0 : index
    %c0_60 = arith.constant 0 : index
    %125 = vector.load %arg16[%c0_58, %c0_59, %c0_60] : memref<1x8x32xf32, #tpu.memory_space<vmem>>, vector<1x8x32xf32>
    %126 = vector.shape_cast %125 : vector<1x8x32xf32> to vector<8x32xf32>
    %127 = vector.shape_cast %124 : vector<8x32xf32> to vector<1x8x32xf32>
    tpu.vector_store %arg16[%c0_58, %c0_59, %c0_60], %127 {strides = array<i32>} : memref<1x8x32xf32, #tpu.memory_space<vmem>>, vector<1x8x32xf32>,
    return
  }
  func.func @transform_0(%arg0: i32, %arg1: i32) -> (i32, i32, i32) {
    %c0_i32 = arith.constant 0 : i32
    %c0_i32_0 = arith.constant 0 : i32
    %c0_i32_1 = arith.constant 0 : i32
    return %arg0, %c0_i32, %c0_i32_0 : i32, i32, i32
  }
  func.func @transform_1(%arg0: i32, %arg1: i32) -> (i32, i32, i32) {
    %c0_i32 = arith.constant 0 : i32
    %c0_i32_0 = arith.constant 0 : i32
    %c0_i32_1 = arith.constant 0 : i32
    return %arg0, %c0_i32, %c0_i32_0 : i32, i32, i32
  }
  func.func @transform_2(%arg0: i32, %arg1: i32) -> (i32, i32) {
    %c0_i32 = arith.constant 0 : i32
    %c0_i32_0 = arith.constant 0 : i32
    %c0_i32_1 = arith.constant 0 : i32
    return %c0_i32, %c0_i32_0 : i32, i32
  }
  func.func @transform_3(%arg0: i32, %arg1: i32) -> (i32, i32) {
    %c0_i32 = arith.constant 0 : i32
    %c0_i32_0 = arith.constant 0 : i32
    %c0_i32_1 = arith.constant 0 : i32
    return %c0_i32, %c0_i32_0 : i32, i32
  }
  func.func @transform_4(%arg0: i32, %arg1: i32) -> (i32, i32) {
    %c0_i32 = arith.constant 0 : i32
    %c0_i32_0 = arith.constant 0 : i32
    %c0_i32_1 = arith.constant 0 : i32
    return %c0_i32, %c0_i32_0 : i32, i32
  }
  func.func @transform_5(%arg0: i32, %arg1: i32) -> (i32, i32) {
    %c0_i32 = arith.constant 0 : i32
    %c0_i32_0 = arith.constant 0 : i32
    %c0_i32_1 = arith.constant 0 : i32
    return %c0_i32, %c0_i32_0 : i32, i32
  }
  func.func @transform_6(%arg0: i32, %arg1: i32) -> (i32, i32) {
    %c0_i32 = arith.constant 0 : i32
    %c0_i32_0 = arith.constant 0 : i32
    %c0_i32_1 = arith.constant 0 : i32
    return %c0_i32, %c0_i32_0 : i32, i32
  }
  func.func @transform_7(%arg0: i32, %arg1: i32) -> (i32, i32) {
    %c0_i32 = arith.constant 0 : i32
    %c0_i32_0 = arith.constant 0 : i32
    %c0_i32_1 = arith.constant 0 : i32
    return %c0_i32, %c0_i32_0 : i32, i32
  }
  func.func @transform_8(%arg0: i32, %arg1: i32) -> (i32, i32) {
    %c0_i32 = arith.constant 0 : i32
    %c0_i32_0 = arith.constant 0 : i32
    %c0_i32_1 = arith.constant 0 : i32
    return %c0_i32, %c0_i32_0 : i32, i32
  }
  func.func @transform_9(%arg0: i32, %arg1: i32) -> (i32, i32) {
    %c0_i32 = arith.constant 0 : i32
    %c0_i32_0 = arith.constant 0 : i32
    %c0_i32_1 = arith.constant 0 : i32
    return %c0_i32, %c0_i32_0 : i32, i32
  }
  func.func @transform_10(%arg0: i32, %arg1: i32) -> (i32, i32) {
    %c0_i32 = arith.constant 0 : i32
    %c0_i32_0 = arith.constant 0 : i32
    %c0_i32_1 = arith.constant 0 : i32
    return %c0_i32, %c0_i32_0 : i32, i32
  }
  func.func @transform_11(%arg0: i32, %arg1: i32) -> (i32, i32) {
    %c0_i32 = arith.constant 0 : i32
    %c0_i32_0 = arith.constant 0 : i32
    %c0_i32_1 = arith.constant 0 : i32
    return %c0_i32, %c0_i32_0 : i32, i32
  }
  func.func @transform_12(%arg0: i32, %arg1: i32) -> (i32, i32) {
    %c0_i32 = arith.constant 0 : i32
    %c0_i32_0 = arith.constant 0 : i32
    %c0_i32_1 = arith.constant 0 : i32
    return %c0_i32, %c0_i32_0 : i32, i32
  }
  func.func @transform_13(%arg0: i32, %arg1: i32) -> (i32, i32) {
    %c0_i32 = arith.constant 0 : i32
    %c0_i32_0 = arith.constant 0 : i32
    %c0_i32_1 = arith.constant 0 : i32
    return %c0_i32, %c0_i32_0 : i32, i32
  }
  func.func @transform_14(%arg0: i32, %arg1: i32) -> (i32, i32, i32) {
    %c0_i32 = arith.constant 0 : i32
    %c0_i32_0 = arith.constant 0 : i32
    return %arg0, %arg1, %c0_i32 : i32, i32, i32
  }
}

</mosaic_0001>

<bundles_post_ra>
// kernel: tpu_custom_call.1
= control target key start
LH: loop header
LB: loop body
LE: loop exit
PB: predicated region body
PF: predicated region fallthrough
CT: control target
= control target key end

     0   :  { %s3150_s0 = inlined_call_operand.vmem [shape: f32[2,8,32], index: 0, kind: input, shape index: {}]   ;;  %s3151_s1 = inlined_call_operand.hbm [shape: s32[2,1,8], index: 1, kind: input, shape index: {}]   ;;  %s3152_s2 = inlined_call_operand.hbm [shape: f32[1,32], index: 2, kind: input, shape index: {}]   ;;  %s3153_s3 = inlined_call_operand.hbm [shape: f32[1,32], index: 3, kind: input, shape index: {}]   ;;  %s3154_s4 = inlined_call_operand.vmem [shape: bf16[32,96], index: 4, kind: input, shape index: {}]   ;;  %s3155_s5 = inlined_call_operand.hbm [shape: f32[1,96], index: 5, kind: input, shape index: {}]   ;;  %s3156_s6 = inlined_call_operand.vmem [shape: bf16[32,32], index: 6, kind: input, shape index: {}]   ;;  %s3157_s7 = inlined_call_operand.hbm [shape: f32[1,32], index: 7, kind: input, shape index: {}]   ;;  %s3158_s8 = inlined_call_operand.hbm [shape: f32[1,32], index: 8, kind: input, shape index: {}]   ;;  %s3159_s9 = inlined_call_operand.hbm [shape: f32[1,32], index: 9, kind: input, shape index: {}]   ;;  %s3160_s10 = inlined_call_operand.vmem [shape: bf16[32,64], index: 10, kind: input, shape index: {}]   ;;  %s3161_s11 = inlined_call_operand.vmem [shape: f32[1,64], index: 11, kind: input, shape index: {}]   ;;  %s3162_s12 = inlined_call_operand.vmem [shape: bf16[64,32], index: 12, kind: input, shape index: {}]   ;;  %s3163_s13 = inlined_call_operand.vmem [shape: f32[1,32], index: 13, kind: input, shape index: {}]   ;;  %s3164_s14 = inlined_call_operand.hbm [shape: f32[2,8,32], index: 14, kind: output, shape index: {}]  }
   0x1   :  { %3171 = sst [smem:[#allocation23_spill]] %s3152_s2 }
   0x2   :  { %3172 = sst [smem:[#allocation24_spill]] %s3153_s3 }
   0x3   :  { %3173 = sst [smem:[#allocation25_spill]] %s3155_s5 }
   0x4   :  { %3174 = sst [smem:[#allocation26_spill]] %s3157_s7 }
   0x5   :  { %3175 = sst [smem:[#allocation27_spill]] %s3158_s8 }
   0x6   :  { %3176 = sst [smem:[#allocation28_spill]] %s3159_s9 }
   0x7   :  { %3177 = sst [smem:[#allocation29_spill]] %s3161_s11 }
   0x8   :  { %3178 = sst [smem:[#allocation30_spill]] %s3163_s13 }
   0x9   :  { %3179 = sst [smem:[#allocation31_spill]] %s3164_s14 }
   0xa   :  { %19 = vsyncpa [#allocation5], 0 }
   0xb   :  { %21 = vsyncpa [#allocation5 + $0x1], 0 }
   0xc   :  { %22 = vsyncpa [#allocation8], 0 }
   0xd   :  { %23 = vsyncpa [#allocation11], 0 }
   0xe   :  { %24 = vsyncpa [#allocation14], 0 }
   0xf   :  { %25 = vsyncpa [#allocation6], 0 }
  0x10   :  { %27 = vsyncpa [#allocation6 + $0x1], 0  ;;  %s2740_s29 = smov 0   ;;  %s2742_s30 = smov 0  }
  0x11   :  { %s2744_s15 = smov 0   ;;  %s2746_s16 = smov 0  }
  0x12   :  { %s2748_s17 = smov 0   ;;  %s2750_s18 = smov 0  }
  0x13 LB: > { %s3165_s19 = sadd.s32 4294967295, %s2643_s18   ;;  %p1987_p0 = scmp.ge.s32.totalorder %s2643_s18, 1  ;;  %s2643_s18 = sphi %s2750_s18, %s33_s18   ;;  %s2639_s17 = sphi %s2748_s17, %s3209_s17   ;;  %s2635_s16 = sphi %s2746_s16, %s3208_s16   ;;  %s2631_s15 = sphi %s2744_s15, %s3207_s15   ;;  %s2627_s30 = sphi %s2742_s30, %s3206_s30   ;;  %s2623_s29 = sphi %s2740_s29, %s3205_s29  }
  0x14   : > { %p2774_p1 = scmp.eq.s32.totalorder %s3165_s19, 0  ;;  %p382_p2 = scmp.lt.s32.totalorder %s2643_s18, 3 }
  0x15   : > { %s2645_s22 = smov [#allocation7]   ;;  %s2646_s24 = smov [#allocation10]  }
  0x16   : > { %s3180_s20 = scalar_select %p2774_p1, 1, 0 }
  0x17   : > { %p2779_p3 = pnand %p1987_p0, %p382_p2  ;;  %s395_s23 = sshll.u32 %s2645_s22, 4  ;;  %s396_s23 = int_to_ptr.vmem [resolvable:$true] %s395_s23 }
  0x18   : > { %s420_s25 = sshll.u32 %s2646_s24, 4  ;;  %s2647_s27 = smov [#allocation13]   ;;  %s421_s25 = int_to_ptr.vmem [resolvable:$true] %s420_s25 }
  0x19   : > { %s3181_s21 = scalar_select %p2779_p3, 1, 0 }
  0x1a   : > { %p2215_p5 = pneg %p2779_p3  ;;  %s445_s28 = sshll.u32 %s2647_s27, 4  ;;  %s2792_s28 = int_to_ptr.vmem [resolvable:$true] %s445_s28 }
  0x1b   : > { %s2378_s19 = scalar_lea.vmem %s396_s23, 16  ;;  %s2385_s24 = scalar_lea.vmem %s396_s23, 32 }
  0x1c   : > { %p2788_p6 = pnand %p2215_p5, %p2774_p1  ;;  %p2379_p8 = scmp.ne.s32.totalorder %s396_s23, %s2378_s19 }
  0x1d   : > { %p2386_p11 = scmp.lt.s32.totalorder %s396_s23, %s396_s23  ;;  %p2387_p12 = scmp.lt.s32.totalorder %s2385_s24, %s2378_s19 }
  0x1e   : > { %p2796_p7 = pneg %p2788_p6 }
  0x1f   : > { %p2388_p13 = por %p2387_p12, %p2386_p11 }
  0x20   : > { %p2381_p9 = pnand %p2379_p8, %p2796_p7 }
  0x22   : > { %p2382_p10 = pneg %p2381_p9 }
  0x24   : > { %p2389_p0 = pnand %p2388_p13, %p2382_p10 }
  0x26   : > { %2392 = shalt.err (!%p2389_p0)
}
  0x27   : > { %s3184_s2 = sld [smem:[#allocation23_spill]]  ;;  %s2404_s13 = scalar_lea.vmem %s421_s25, 16 }
  0x28   : > { %p2405_p2 = scmp.ne.s32.totalorder %s421_s25, %s2404_s13  ;;  %s2411_s11 = scalar_lea.vmem %s421_s25, 32 }
  0x29   : > { %p2412_p8 = scmp.lt.s32.totalorder %s421_s25, %s421_s25  ;;  %p2413_p9 = scmp.lt.s32.totalorder %s2411_s11, %s2404_s13 }
  0x2a   : > { %p2407_p5 = pnand %p2405_p2, %p2796_p7 }
  0x2b   : > { %p2414_p3 = por %p2413_p9, %p2412_p8 }
  0x2c   : > { %p2408_p4 = pneg %p2407_p5 }
  0x2d   : > { %2218 = dma.hbm_to_vmem [thread:$0]  (!%p2788_p6), %s3184_s2, 16, %s396_s23, [#allocation8]  }
  0x2e   : > { %p2415_p1 = pnand %p2414_p3, %p2408_p4 }
  0x30   : > { %2418 = shalt.err (!%p2415_p1)
}
  0x31   : > { %s3185_s5 = sld [smem:[#allocation25_spill]]  ;;  %s2430_s14 = scalar_lea.vmem %s2792_s28, 16 }
  0x32   : > { %p2431_p10 = scmp.ne.s32.totalorder %s2792_s28, %s2430_s14  ;;  %s2437_s11 = scalar_lea.vmem %s2792_s28, 32 }
  0x33   : > { %p2438_p3 = scmp.lt.s32.totalorder %s2792_s28, %s2792_s28  ;;  %p2439_p1 = scmp.lt.s32.totalorder %s2437_s11, %s2430_s14 }
  0x34   : > { %p2433_p11 = pnand %p2431_p10, %p2796_p7 }
  0x35   : > { %p2440_p4 = por %p2439_p1, %p2438_p3 }
  0x36   : > { %p2434_p12 = pneg %p2433_p11 }
  0x37   : > { %2224 = dma.hbm_to_vmem [thread:$0]  (!%p2788_p6), %s3185_s5, 16, %s421_s25, [#allocation11]  }
  0x38   : > { %p2441_p13 = pnand %p2440_p4, %p2434_p12 }
  0x3a   : > { %2444 = shalt.err (!%p2441_p13)
}
  0x3b   : > { %s3186_s8 = sld [smem:[#allocation27_spill]]  ;;  %s2648_s25 = smov [#allocation9]  }
  0x3c   : > { %s406_s27 = sshll.u32 %s2648_s25, 4  ;;  %s2649_s19 = smov [#allocation12]   ;;  %s407_s27 = int_to_ptr.vmem [resolvable:$true] %s406_s27 }
  0x3d   : > { %s434_s24 = sshll.u32 %s2649_s19, 4  ;;  %s2456_s2 = scalar_lea.vmem %s407_s27, 16  ;;  %s435_s24 = int_to_ptr.vmem [resolvable:$true] %s434_s24 }
  0x3e   : > { %p2457_p0 = scmp.ne.s32.totalorder %s407_s27, %s2456_s2  ;;  %s2463_s14 = scalar_lea.vmem %s407_s27, 32 }
  0x3f   : > { %p2464_p8 = scmp.lt.s32.totalorder %s407_s27, %s407_s27  ;;  %p2465_p9 = scmp.lt.s32.totalorder %s2463_s14, %s2456_s2 }
  0x40   : > { %p2459_p2 = pnand %p2457_p0, %p2796_p7 }
  0x41   : > { %2230 = dma.hbm_to_vmem [thread:$0]  (!%p2788_p6), %s3186_s8, 16, %s2792_s28, [#allocation14]  }
  0x42   : > { %p2460_p5 = pneg %p2459_p2  ;;  %p2466_p10 = por %p2465_p9, %p2464_p8 }
  0x44   : > { %p2467_p11 = pnand %p2466_p10, %p2460_p5 }
  0x46   : > { %2470 = shalt.err (!%p2467_p11)
}
  0x47   : > { %s3187_s3 = sld [smem:[#allocation24_spill]]  ;;  %s2482_s13 = scalar_lea.vmem %s435_s24, 16 }
  0x48   : > { %p2483_p12 = scmp.ne.s32.totalorder %s435_s24, %s2482_s13  ;;  %s2489_s23 = scalar_lea.vmem %s435_s24, 32 }
  0x49   : > { %p2490_p4 = scmp.lt.s32.totalorder %s435_s24, %s435_s24  ;;  %p2491_p13 = scmp.lt.s32.totalorder %s2489_s23, %s2482_s13 }
  0x4a   : > { %p2485_p3 = pnand %p2483_p12, %p2796_p7 }
  0x4b   : > { %p2492_p0 = por %p2491_p13, %p2490_p4 }
  0x4c   : > { %p2486_p1 = pneg %p2485_p3 }
  0x4d   : > { %2221 = dma.hbm_to_vmem [thread:$0]  (!%p2788_p6), %s3187_s3, 16, %s407_s27, [#allocation8]  }
  0x4e   : > { %p2493_p2 = pnand %p2492_p0, %p2486_p1 }
  0x50   : > { %2496 = shalt.err (!%p2493_p2)
}
  0x51   : > { %s3188_s7 = sld [smem:[#allocation26_spill]]  ;;  %s2650_s27 = smov [#allocation15]  }
  0x52   : > { %s456_s19 = sshll.u32 %s2650_s27, 4  ;;  %s457_s19 = int_to_ptr.vmem [resolvable:$true] %s456_s19 }
  0x53   : > { %s2508_s14 = scalar_lea.vmem %s457_s19, 16  ;;  %s2515_s11 = scalar_lea.vmem %s457_s19, 32 }
  0x54   : > { %p2509_p5 = scmp.ne.s32.totalorder %s457_s19, %s2508_s14  ;;  %p2516_p10 = scmp.lt.s32.totalorder %s457_s19, %s457_s19 }
  0x55   : > { %p2517_p11 = scmp.lt.s32.totalorder %s2515_s11, %s2508_s14 }
  0x56   : > { %p2511_p8 = pnand %p2509_p5, %p2796_p7 }
  0x57   : > { %2227 = dma.hbm_to_vmem [thread:$0]  (!%p2788_p6), %s3188_s7, 16, %s435_s24, [#allocation11]  }
  0x58   : > { %p2512_p9 = pneg %p2511_p8  ;;  %p2518_p12 = por %p2517_p11, %p2516_p10 }
  0x5a   : > { %p2519_p3 = pnand %p2518_p12, %p2512_p9 }
  0x5c   : > { %2522 = shalt.err (!%p2519_p3)
}
  0x5d   : > { %s3189_s9 = sld [smem:[#allocation28_spill]]  ;;  %s1986_s22 = sadd.s32 4294967294, %s2643_s18  }
  0x5e   : > { %s45_s24 = sadd.s32 1, %s2639_s17  ;;  %s78_s26 = sadd.s32 1, %s2631_s15 }
  0x5f   : > { %p47_p7 = scmp.ge.s32.totalorder %s45_s24, 2  ;;  %p85_p1 = scmp.ne.s32.totalorder %s2631_s15, %s2627_s30 }
  0x60   : > { %p86_p4 = scmp.eq.s32.totalorder %s2643_s18, 0  ;;  %p91_p0 = scmp.ne.s32.totalorder %s2627_s30, %s2623_s29 }
  0x61   : > { %s3211_s24 = smov (%p47_p7, %s45_s24), 0  ;;  %s3192_s25 = sadd.s32 4294967295, %s2643_s18  }
  0x62   : > { %3190 = sst [smem:[#allocation22_spill]] %s3211_s24  ;;  %p2856_p13 = por %p86_p4, %p85_p1 }
  0x63   : > { %2233 = dma.hbm_to_vmem [thread:$0]  (!%p2788_p6), %s3189_s9, 16, %s457_s19, [#allocation14]  }
  0x64   : > { %s75_s2 = ssub.s32 %s2639_s17, %s3211_s24  ;;  %p369_p6 = scmp.eq.s32.totalorder %s3192_s25, 1 }
  0x65   : > { %p76_p2 = scmp.eq.s32.totalorder %s75_s2, 0  ;;  %p3193_p5 = scmp.ne.s32.totalorder %s3180_s20, 0 }
  0x66   : > { %p2872_p9 = por %p369_p6, %p85_p1  ;;  %p375_p10 = scmp.eq.s32.totalorder %s1986_s22, 1 }
  0x67   : > { %p2868_p8 = por %p3193_p5, %p91_p0  ;;  %p2248_p12 = scmp.lt.s32.totalorder %s2643_s18, 2 }
  0x68   : > { %s2877_s14 = scalar_select %p76_p2, %s2631_s15, %s78_s26  }
  0x69   : > { %p2879_p11 = por %p375_p10, %p91_p0  ;;  %s486_s28 = sand.u32 1, %s2631_s15  }
  0x6a   : > { %s1995_s13 = sshll.u32 %s2639_s17, 4  ;;  %s489_s5 = scalar_lea.vmem [#allocation4], %s486_s28 }
  0x6b   : > { %s494_s3 = scalar_lea.hbm %s3151_s1, %s1995_s13  ;;  %s496_s7 = sshll.u32 %s489_s5, 4  ;;  %s497_s7 = int_to_ptr.vmem [resolvable:$true] %s496_s7 }
  0x6c   : > { %p2891_p3 = pnand %p2248_p12, %p2856_p13  ;;  %s487_s22 = scalar_lea.sflag [#allocation5], %s486_s28 }
  0x6d   : > { %s2536_s26 = scalar_lea.vmem %s497_s7, 16  ;;  %s2651_s9 = smov [#allocation4]  }
  0x6e   : > { %p2525_p7 = pneg %p2891_p3  ;;  %p2537_p1 = scmp.ne.s32.totalorder %s497_s7, %s2536_s26 }
  0x6f   : > { %s2541_s24 = sshll.u32 %s2651_s9, 4  ;;  %s2542_s24 = int_to_ptr.vmem [resolvable:$false] %s2541_s24 }
  0x70   : > { %p2539_p4 = pnand %p2537_p1, %p2525_p7  ;;  %s2543_s13 = scalar_lea.vmem %s2542_s24, 32 }
  0x71   : > { %p2544_p6 = scmp.lt.s32.totalorder %s497_s7, %s2542_s24  ;;  %p2545_p2 = scmp.lt.s32.totalorder %s2543_s13, %s2536_s26 }
  0x72   : > { %p2540_p0 = pneg %p2539_p4 }
  0x73   : > { %p2546_p5 = por %p2545_p2, %p2544_p6 }
  0x75   : > { %p2547_p10 = pnand %p2546_p5, %p2540_p0 }
  0x77   : > { %2550 = shalt.err (!%p2547_p10)
}
  0x78   : > { %2237 = dma.hbm_to_vmem [thread:$0]  (!%p2891_p3), %s494_s3, 16, %s497_s7, %s487_s22  }
  0x79   : > { %p3198_p13 = scmp.ne.s32.totalorder %s3181_s21, 0 }
  0x7a   : > { %s2902_s5 = sand.u32 (!%p3198_p13), 1, %s2627_s30  }
  0x7b   : > { %505 = sbr.rel (%p3198_p13) target bundleno = 2492 (0x9bc), region = 76  ;;  %s508_s9 = scalar_lea.sflag (!%p3198_p13), [#allocation5], %s2902_s5 }
  0x7c   : > { %s510_s23 = scalar_lea.vmem (!%p3198_p13), [#allocation4], %s2902_s5 }
  0x80   : > { %2602 = dma.done.wait (%p2868_p8), %s508_s9, 16  }
  0x81   : > { %2604 = vsyncadd (%p2868_p8), %s508_s9, 4294967280  ;;  %p3199_p12 = scmp.ne.s32.totalorder %s3180_s20, 0 }
  0x83   : > { %2606 = dma.done.wait (%p3199_p12), [#allocation8], 32  }
  0x84   : > { %2608 = vsyncadd (%p3199_p12), [#allocation8], 4294967264 }
  0x85   : > { %2610 = dma.done.wait (%p3199_p12), [#allocation11], 32  }
  0x86   : > { %2612 = vsyncadd (%p3199_p12), [#allocation11], 4294967264 }
  0x87   : > { %2614 = dma.done.wait (%p3199_p12), [#allocation14], 32  }
  0x88   : > { %2616 = vsyncadd (%p3199_p12), [#allocation14], 4294967264  ;;  %p582_p8 = scmp.lt.s32.totalorder %s2635_s16, 1  ;;  %vm594_vm0 = vcmask 261120   ;;  %v2324_v2 = vld [vmem:[%s3154_s4] sm:$0xff]   ;;  %s2652_s28 = smov 96  }
  0x89   : > { %v2934_v3 = vld [vmem:[#allocation10] ss:$0 sm:$0xff]  ;;  %s2653_s22 = smov 64   ;;  %v2326_v5 = vld [vmem:[%s3154_s4] sm:$0xff]   ;;  %v2654_v14 = vmov 0.0   ;;  %vm2655_vm1 = vmmov 0  }
  0x8a   : > { %s583_s3 = scalar_select %p582_p8, %s2635_s16, 1  ;;  %v2325_v4 = vld [vmem:[%s3154_s4 + $0x8] sm:$0xff]   ;;  %2087 = vmatprep.subr.bf16.mxu0 %v2654_v14  ;;  %2095 = vmatprep.subr.bf16.mxu1 %v2654_v14  ;;  %v2328_v34 = vld [vmem:[%s3154_s4] sm:$0xff]   ;;  %vm697_vm2 = vcmask 257024   ;;  %vm976_vm3 = vcmask 1043456   ;;  %vm972_vm4 = vcmask 64512  }
  0x8b   : > { %v2323_v12 = vld [vmem:[%s3154_s4 + $0x8] sm:$0xff]   ;;  %2091 = vmatprep.mubr.msk.bf16.mxu0 %vm2655_vm1, %v2654_v14  ;;  %2099 = vmatprep.mubr.msk.bf16.mxu1 %vm2655_vm1, %v2654_v14  ;;  %s2656_s27 = smov 120   ;;  %s2657_s20 = smov 112   ;;  %vm1567_vm6 = vcmask 130048   ;;  %vm1569_vm7 = vcmask 195584   ;;  %vm1777_vm8 = vcmask 523264  }
  0x8c   : > { %s2004_s7 = sshll.u32 %s583_s3, 3  ;;  %v2005_v27 = vld [vmem:[#allocation7] ss:$0 sm:$0xff]  ;;  %v2006_v29 = vld [vmem:[#allocation9] ss:$0 sm:$0xff]  ;;  %s2661_s26 = smov 16  }
  0x8d   : > { %s585_s24 = scalar_lea.vmem %s3150_s0, %s2004_s7  ;;  %v2327_v32 = vld [vmem:[%s3154_s4 + $0x8] sm:$0xff]   ;;  %s2662_s13 = smov 8  }
  0x8e   : > { %v2927_v0 = vld [vmem:[%s585_s24] sm:$0xff]  ;;  %s2663_s9 = smov 24   ;;  %s2003_s3 = sshll.u32 %s2902_s5, 3 }
  0x8f   : > { %v595_v1 = vsel %vm594_vm0, %v2927_v0, 0.0  ;;  %s3201_s21 = sld [smem:[#allocation30_spill]]  ;;  %s2048_s24 = sshll.u32 %s2635_s16, 7 }
  0x90   : > { %596 = vadd.xlane.f32.xlu0 %v595_v1  ;;  %s3202_s2 = sld [smem:[#allocation31_spill]]  ;;  %s1824_s16 = scalar_lea.sflag [#allocation6], %s2902_s5 }
  0x94   : > { %777 = vadd.xlane.f32.xlu0 %v595_v1 }
  0x96   : > { %s3101_s25 = scalar_lea.hbm %s3202_s2, %s2048_s24 }
  0xaa   : > { %644 = vrot.lane.b32.xlu0 %v2324_v2, %s2652_s28 }
  0xae   : > { %650 = vrot.lane.b32.xlu0 %v2934_v3, %s2652_s28 }
  0xb2   : > { %721 = vrot.lane.b32.xlu0 %v2325_v4, %s2653_s22 }
  0xb6   : > { %719 = vrot.lane.b32.xlu0 %v2326_v5, %s2653_s22 }
 0x119   : > { %v597_v6 = vpop.xlane.xlu0 %596 }
 0x11a   : > { %v599_v7 = vmul.f32 0.03125, %v597_v6 }
 0x11c   : > { %v600_v8 = vsub.f32 %v2927_v0, %v599_v7 }
 0x11d   : > { %v778_v11 = vpop.xlane.xlu0 %777 }
 0x11e   : > { %v601_v9 = vmul.f32 %v600_v8, %v600_v8  ;;  %v780_v18 = vmul.f32 0.03125, %v778_v11 }
 0x120   : > { %v602_v10 = vsel %vm594_vm0, %v601_v9, 0.0  ;;  %v781_v19 = vsub.f32 %v2927_v0, %v780_v18  ;;  %v903_v18 = vlaneseq }
 0x121   : > { %603 = vadd.xlane.f32.xlu1 %v602_v10  ;;  %v645_v13 = vpop.permute.xlu0 %644 }
 0x122   : > { %v782_v20 = vmul.f32 %v781_v19, %v781_v19 }
 0x124   : > { %v783_v21 = vsel %vm594_vm0, %v782_v20, 0.0  ;;  %v3018_v20 = vshrl.u32 %v903_v18, 7 }
 0x125   : > { %v651_v15 = vpop.permute.xlu0 %650 }
 0x129   : > { %v722_v16 = vpop.permute.xlu0 %721 }
 0x12a   : > { %2096 = vmatpush3.bf16.msra.mxu1 %v722_v16 }
 0x12b   : > { %2097 = vmatprep.subr.bf16.mxu1 %v2654_v14 }
 0x12d   : > { %v720_v17 = vpop.permute.xlu0 %719 }
 0x12e   : > { %2098 = vmatpush3.bf16.msra.mxu1 %v720_v17 }
 0x12f   : > { %2111 = vmatprep.subr.bf16.mxu1 %v2654_v14 }
 0x132   : > { %646 = vrot.lane.b32.xlu1 %v2323_v12, %s2652_s28  ;;  %s2658_s28 = smov 104  }
 0x156   : > { %784 = vadd.xlane.f32.xlu1 %v783_v21  ;;  %v905_v21 = vsub.s32 0, %v3018_v20 }
 0x1aa   : > { %v604_v22 = vpop.xlane.xlu1 %603 }
 0x1ab   : > { %v605_v23 = vmul.f32 0.03125, %v604_v22 }
 0x1ad   : > { %v606_v24 = vadd.f32 1e-05, %v605_v23 }
 0x1ae   : > { %v647_v25 = vpop.permute.xlu1 %646 }
 0x1af   : > { %2337 = vrsqrt.f32 %v606_v24  ;;  %2088 = vmatpush3.bf16.msra.mxu0 %v647_v25 }
 0x1b0   : > { %2089 = vmatprep.subr.bf16.mxu0 %v2654_v14 }
 0x1b3   : > { %2090 = vmatpush3.bf16.msra.mxu0 %v645_v13 }
 0x1b4   : > { %2103 = vmatprep.subr.bf16.mxu0 %v2654_v14 }
 0x1bc   : > { %v2338_v26 = vpop.eup %2337 }
 0x1bd   : > { %v608_v28 = vmul.f32 %v2338_v26, %v600_v8 }
 0x1bf   : > { %v615_v30 = vmul.f32 %v2005_v27, %v608_v28 }
 0x1c1   : > { %v622_v31 = vadd.f32 %v2006_v29, %v615_v30 }
 0x1c3   : > { %v623_v33 = vpack.c.bf16 %v622_v31, %v622_v31 }
 0x1c5   : > { %2092 = vmatmul.mubr.msk.bf16.vlgmr.msra.gmra.mxu0 %vm594_vm0, %v623_v33  ;;  %2100 = vmatmul.mubr.msk.bf16.vlgmr.msra.gmra.mxu1 %vm594_vm0, %v623_v33 }
 0x1c6   : > { %2104 = vmatpush3.bf16.msra.mxu0 %v2327_v32  ;;  %2107 = vmatprep.mubr.msk.bf16.mxu0 %vm2655_vm1, %v2654_v14 }
 0x1c7   : > { %2105 = vmatprep.subr.bf16.mxu0 %v2654_v14  ;;  %2113 = vmatprep.mubr.msk.bf16.mxu1 %vm2655_vm1, %v2654_v14 }
 0x1ca   : > { %2106 = vmatpush3.bf16.msra.mxu0 %v2328_v34 }
 0x1cb   : > { %2117 = vmatprep.subr.bf16.mxu0 %v2654_v14 }
 0x1df   : > { %v785_v35 = vpop.xlane.xlu1 %784 }
 0x1e0   : > { %v786_v36 = vmul.f32 0.03125, %v785_v35 }
 0x1e2   : > { %v787_v37 = vadd.f32 1e-05, %v786_v36 }
 0x1e4   : > { %2339 = vrsqrt.f32 %v787_v37 }
 0x1f1   : > { %v2340_v38 = vpop.eup %2339 }
 0x1f2   : > { %v789_v39 = vmul.f32 %v2340_v38, %v781_v19  ;;  %v899_v19 = vld [vmem:[%s510_s23] sm:$0x1] }
 0x1f3   : > { %vm900_vm5 = vcmp.eq.s32.totalorder %v899_v19, 0 }
 0x1f4   : > { %v796_v40 = vmul.f32 %v2005_v27, %v789_v39  ;;  %v901_v22 = vsel %vm900_vm5, -1e+09, %v2654_v14 }
 0x1f5   : > { %v906_v23 = vrot.slane %v901_v22, %v905_v21 }
 0x1f6   : > { %v803_v41 = vadd.f32 %v2006_v29, %v796_v40 }
 0x1f8   : > { %v804_v42 = vpack.c.bf16 %v803_v41, %v803_v41 }
 0x1fa   : > { %2108 = vmatmul.mubr.msk.bf16.vlgmr.msra.gmra.mxu0 %vm594_vm0, %v804_v42 }
 0x1fb   : > { %2119 = vmatprep.mubr.msk.bf16.mxu0 %vm2655_vm1, %v2654_v14 }
 0x285   : > { %v690_v43 = vpop.f32.mrf.mxu0  ;;  %v2979_v44 = vpop.f32.mrf.mxu1 }
 0x286   : > { %v691_v45 = vadd.f32 %v690_v43, %v651_v15 }
 0x287   : > { %v2093_v46 = vpop.f32.mrf.mxu0  ;;  %v2101_v47 = vpop.f32.mrf.mxu1 }
 0x288   : > { %v696_v48 = vpack.c.bf16 %v691_v45, %v691_v45 }
 0x289   : > { %v693_v49 = vpop.f32.mrf.mxu0  ;;  %v765_v50 = vpop.f32.mrf.mxu1 }
 0x28a   : > { %698 = vst.msk [vmem:[#allocation2] sm:$0xf] %vm697_vm2, %v696_v48 }
 0x28b   : > { %v2094_v51 = vpop.f32.mrf.mxu0  ;;  %v2102_v52 = vpop.f32.mrf.mxu1 }
 0x291   : > { %v880_v53 = vld [vmem:[#allocation2] sm:$0xf] }
 0x292   : > { %882 = vrot.lane.b32.xlu0 %v880_v53, %s2656_s27 }
 0x296   : > { %885 = vrot.lane.b32.xlu0 %v880_v53, %s2657_s20 }
 0x29a   : > { %888 = vrot.lane.b32.xlu0 %v880_v53, %s2658_s28 }
 0x2b8   : > { %908 = vxpose.xlu0.c.b16.start.end [1/1] (short) (narrow) %v880_v53, 16 }
 0x2ba   : > { %v865_v54 = vpop.f32.mrf.mxu0 }
 0x2bb   : > { %v866_v55 = vadd.f32 %v2934_v3, %v865_v54 }
 0x2bc   : > { %v2109_v56 = vpop.f32.mrf.mxu0 }
 0x2bd   : > { %v871_v57 = vmul.f32 0.35355338, %v866_v55 }
 0x2be   : > { %v868_v58 = vpop.f32.mrf.mxu0 }
 0x2bf   : > { %v872_v59 = vpack.c.bf16 %v871_v57, %v871_v57 }
 0x2c0   : > { %v2110_v60 = vpop.f32.mrf.mxu0 }
 0x2c1   : > { %876 = vrot.lane.b32.xlu1 %v872_v59, %s2657_s20  ;;  %874 = vrot.lane.b32.xlu0 %v872_v59, %s2656_s27 }
 0x2c5   : > { %878 = vrot.lane.b32.xlu0 %v872_v59, %s2658_s28 }
 0x304   : > { %v883_v61 = vpop.permute.xlu0 %882 }
 0x305   : > { %924 = vxpose.xlu1.c.b16.start.end [1/1] (short) (narrow) %v883_v61, 16 }
 0x308   : > { %v886_v62 = vpop.permute.xlu0 %885 }
 0x309   : > { %940 = vxpose.xlu0.c.b16.start.end [1/1] (short) (narrow) %v886_v62, 16 }
 0x30c   : > { %v889_v63 = vpop.permute.xlu0 %888 }
 0x30d   : > { %956 = vxpose.xlu0.c.b16.start.end [1/1] (short) (narrow) %v889_v63, 16 }
 0x316   : > { %725 = vrot.lane.b32.xlu0 %v2934_v3, %s2653_s22 }
 0x31a   : > { %v916_v1 = vpop.trf.xlu0 }
 0x31b   : > { %v978_v2 = vsel %vm976_vm3, %v916_v1, 0 }
 0x31c   : > { %2112 = vmatpush3.bf16.msra.mxu1 %v978_v2 }
 0x31d   : > { %2123 = vmatprep.subr.bf16.mxu1 %v2654_v14 }
 0x31f   : > { %2114 = vmatmul.mubr.msk.bf16.vlgmr.msra.gmra.mxu1 %vm972_vm4, %v872_v59 }
 0x320   : > { %2125 = vmatprep.mubr.msk.bf16.mxu1 %vm2655_vm1, %v2654_v14 }
 0x333   : > { %v875_v4 = vpop.permute.xlu0 %874  ;;  %v877_v5 = vpop.permute.xlu1 %876 }
 0x337   : > { %v879_v6 = vpop.permute.xlu0 %878 }
 0x367   : > { %v932_v7 = vpop.trf.xlu1 }
 0x368   : > { %v1024_v8 = vsel %vm976_vm3, %v932_v7, 0 }
 0x369   : > { %2118 = vmatpush3.bf16.msra.mxu0 %v1024_v8 }
 0x36a   : > { %2129 = vmatprep.subr.bf16.mxu0 %v2654_v14 }
 0x36b   : > { %v948_v3 = vpop.trf.xlu0 }
 0x36c   : > { %v1070_v9 = vsel %vm976_vm3, %v948_v3, 0  ;;  %2120 = vmatmul.mubr.msk.bf16.vlgmr.msra.gmra.mxu0 %vm972_vm4, %v875_v4 }
 0x36d   : > { %2124 = vmatpush3.bf16.msra.mxu1 %v1070_v9  ;;  %2131 = vmatprep.mubr.msk.bf16.mxu0 %vm2655_vm1, %v2654_v14 }
 0x36e   : > { %2135 = vmatprep.subr.bf16.mxu1 %v2654_v14 }
 0x36f   : > { %v964_v10 = vpop.trf.xlu0 }
 0x370   : > { %v1116_v11 = vsel %vm976_vm3, %v964_v10, 0  ;;  %2126 = vmatmul.mubr.msk.bf16.vlgmr.msra.gmra.mxu1 %vm972_vm4, %v877_v5 }
 0x371   : > { %2130 = vmatpush3.bf16.msra.mxu0 %v1116_v11  ;;  %2137 = vmatprep.mubr.msk.bf16.mxu1 %vm2655_vm1, %v2654_v14 }
 0x372   : > { %2141 = vmatprep.subr.bf16.mxu0 %v2654_v14 }
 0x374   : > { %2132 = vmatmul.mubr.msk.bf16.vlgmr.msra.gmra.mxu0 %vm972_vm4, %v879_v6 }
 0x375   : > { %2143 = vmatprep.mubr.msk.bf16.mxu0 %vm2655_vm1, %v2654_v14 }
 0x388   : > { %v726_v12 = vpop.permute.xlu0 %725 }
 0x389   : > { %v763_v13 = vadd.f32 %v2979_v44, %v726_v12 }
 0x38b   : > { %v768_v15 = vpack.c.bf16 %v763_v13, %v763_v13 }
 0x38d   : > { %769 = vst.msk [vmem:[#allocation3] sm:$0xf] %vm697_vm2, %v768_v15 }
 0x394   : > { %v891_v16 = vld [vmem:[#allocation3] sm:$0xf] }
 0x395   : > { %893 = vrot.lane.b32.xlu1 %v891_v16, %s2656_s27  ;;  %v1226_v17 = vsel %vm976_vm3, %v891_v16, 0  ;;  %s581_s27 = scalar_lea.vmem [#allocation16], %s2003_s3 }
 0x396   : > { %2136 = vmatpush3.bf16.msra.mxu1 %v1226_v17 }
 0x397   : > { %2147 = vmatprep.subr.bf16.mxu1 %v2654_v14 }
 0x3df   : > { %v1014_v24 = vpop.f32.mrf.mxu1 }
 0x3e0   : > { %v1015_v25 = vadd.f32 %v1014_v24, %v906_v23 }
 0x3e1   : > { %v2115_v26 = vpop.f32.mrf.mxu1 }
 0x3e2   : > { %v1158_v27 = vsel %vm972_vm4, %v1015_v25, -inf }
 0x3e3   : > { %1159 = vmax.xlane.f32.xlu0 %v1158_v27  ;;  %v1017_v28 = vpop.f32.mrf.mxu1 }
 0x3e5   : > { %v2116_v29 = vpop.f32.mrf.mxu1 }
 0x3f9   : > { %895 = vrot.lane.b32.xlu0 %v891_v16, %s2657_s20  ;;  %s1838_s20 = sshll.u32 %s581_s27, 4  ;;  %s3103_s20 = int_to_ptr.vmem [resolvable:$true] %s1838_s20 }
 0x3fa   : > { %s2551_s22 = scalar_lea.vmem %s3103_s20, 128 }
 0x3fb   : > { %p2552_p3 = scmp.ne.s32.totalorder %s3103_s20, %s2551_s22 }
 0x3fd   : > { %p2553_p7 = pnand %p2552_p3, %p2872_p9 }
 0x3ff   : > { %p2554_p1 = pneg %p2553_p7 }
 0x407   : > { %v894_v30 = vpop.permute.xlu1 %893 }
 0x408   : > { %v1272_v31 = vsel %vm976_vm3, %v894_v30, 0 }
 0x409   : > { %2142 = vmatpush3.bf16.msra.mxu0 %v1272_v31 }
 0x40a   : > { %2153 = vmatprep.subr.bf16.mxu0 %v2654_v14 }
 0x42c   : > { %v1060_v32 = vpop.f32.mrf.mxu0 }
 0x42d   : > { %v1061_v33 = vadd.f32 %v1060_v32, %v906_v23 }
 0x42e   : > { %v2121_v34 = vpop.f32.mrf.mxu0 }
 0x42f   : > { %v1161_v35 = vsel %vm972_vm4, %v1061_v33, -inf }
 0x430   : > { %v1063_v36 = vpop.f32.mrf.mxu0  ;;  %v1106_v37 = vpop.f32.mrf.mxu1  ;;  %1162 = vmax.xlane.f32.xlu1 %v1161_v35 }
 0x431   : > { %v1107_v38 = vadd.f32 %v1106_v37, %v906_v23 }
 0x432   : > { %v2122_v39 = vpop.f32.mrf.mxu0  ;;  %v2127_v40 = vpop.f32.mrf.mxu1 }
 0x433   : > { %v1164_v41 = vsel %vm972_vm4, %v1107_v38, -inf }
 0x434   : > { %v1109_v42 = vpop.f32.mrf.mxu1  ;;  %v1152_v43 = vpop.f32.mrf.mxu0  ;;  %1165 = vmax.xlane.f32.xlu1 %v1164_v41 }
 0x435   : > { %v1153_v44 = vadd.f32 %v1152_v43, %v906_v23 }
 0x436   : > { %v2128_v45 = vpop.f32.mrf.mxu1  ;;  %v2133_v46 = vpop.f32.mrf.mxu0 }
 0x437   : > { %v1167_v47 = vsel %vm972_vm4, %v1153_v44, -inf }
 0x438   : > { %v1155_v48 = vpop.f32.mrf.mxu0  ;;  %1168 = vmax.xlane.f32.xlu1 %v1167_v47 }
 0x43a   : > { %v2134_v49 = vpop.f32.mrf.mxu0 }
 0x449   : > { %897 = vrot.lane.b32.xlu1 %v891_v16, %s2658_s28 }
 0x46c   : > { %v1160_v50 = vpop.xlane.xlu0 %1159 }
 0x46d   : > { %v1170_v51 = vmax.f32 %v1160_v50, -1e+30 }
 0x46f   : > { %v1186_v52 = vsub.f32 %v1015_v25, %v1170_v51  ;;  %v1174_v21 = vsub.f32 -1e+30, %v1170_v51 }
 0x470   : > { %v896_v55 = vpop.permute.xlu0 %895 }
 0x471   : > { %v1190_v53 = vmul.f32 1.442695, %v1186_v52  ;;  %v1318_v58 = vsel %vm976_vm3, %v896_v55, 0  ;;  %v1178_v22 = vmul.f32 1.442695, %v1174_v21 }
 0x473   : > { %2341 = vpow2.f32 %v1190_v53 }
 0x480   : > { %v2342_v54 = vpop.eup %2341 }
 0x481   : > { %v1202_v56 = vsel %vm972_vm4, %v2342_v54, 0.0  ;;  %v1218_v57 = vpack.c.bf16 %v2342_v54, %v2342_v54  ;;  %v2659_v54 = vmov 1983009808  }
 0x482   : > { %1203 = vadd.xlane.f32.xlu1 %v1202_v56  ;;  %v1421_v55 = vunpack.c.l.s4 %v2659_v54 }
 0x483   : > { %2138 = vmatmul.mubr.msk.bf16.vlgmr.msra.gmra.mxu1 %vm972_vm4, %v1218_v57 }
 0x484   : > { %2148 = vmatpush3.bf16.msra.mxu1 %v1318_v58  ;;  %2149 = vmatprep.mubr.msk.bf16.mxu1 %vm2655_vm1, %v2654_v14 }
 0x485   : > { %2159 = vmatprep.subr.bf16.mxu1 %v2654_v14 }
 0x4b9   : > { %v1163_v59 = vpop.xlane.xlu1 %1162 }
 0x4ba   : > { %v1171_v60 = vmax.f32 %v1163_v59, -1e+30 }
 0x4bc   : > { %v1187_v61 = vsub.f32 %v1061_v33, %v1171_v60  ;;  %v1175_v35 = vsub.f32 -1e+30, %v1171_v60  ;;  %v2660_v60 = vmov 1934713408  }
 0x4bd   : > { %v1166_v62 = vpop.xlane.xlu1 %1165 }
 0x4be   : > { %v1192_v63 = vmul.f32 1.442695, %v1187_v61  ;;  %v1172_v1 = vmax.f32 %v1166_v62, -1e+30  ;;  %v1453_v61 = vunpack.c.l.s4 %v2660_v60 }
 0x4c0   : > { %v1188_v2 = vsub.f32 %v1107_v38, %v1172_v1  ;;  %2343 = vpow2.f32 %v1192_v63  ;;  %v1176_v34 = vsub.f32 -1e+30, %v1172_v1  ;;  %v1180_v38 = vmul.f32 1.442695, %v1175_v35 }
 0x4c1   : > { %v1169_v4 = vpop.xlane.xlu1 %1168  ;;  %v1422_v1 = vunpack.c.0.s8 %v1421_v55 }
 0x4c2   : > { %v1194_v5 = vmul.f32 1.442695, %v1188_v2  ;;  %v1173_v6 = vmax.f32 %v1169_v4, -1e+30  ;;  %v1182_v36 = vmul.f32 1.442695, %v1176_v34 }
 0x4c4   : > { %v1189_v7 = vsub.f32 %v1153_v44, %v1173_v6  ;;  %2345 = vpow2.f32 %v1194_v5  ;;  %v1177_v37 = vsub.f32 -1e+30, %v1173_v6 }
 0x4c5   : > { %v898_v9 = vpop.permute.xlu1 %897 }
 0x4c6   : > { %v1196_v8 = vmul.f32 1.442695, %v1189_v7  ;;  %v1364_v12 = vsel %vm976_vm3, %v898_v9, 0  ;;  %v1184_v39 = vmul.f32 1.442695, %v1177_v37 }
 0x4c8   : > { %2347 = vpow2.f32 %v1196_v8 }
 0x4c9   : > { %2349 = vpow2.f32 %v1178_v22 }
 0x4cd   : > { %v2344_v3 = vpop.eup %2343 }
 0x4ce   : > { %v1205_v10 = vsel %vm972_vm4, %v2344_v3, 0.0  ;;  %v1219_v11 = vpack.c.bf16 %v2344_v3, %v2344_v3 }
 0x4cf   : > { %1206 = vadd.xlane.f32.xlu0 %v1205_v10 }
 0x4d0   : > { %2144 = vmatmul.mubr.msk.bf16.vlgmr.msra.gmra.mxu0 %vm972_vm4, %v1219_v11  ;;  %v1454_v11 = vunpack.c.0.s8 %v1453_v61 }
 0x4d1   : > { %v2346_v13 = vpop.eup %2345  ;;  %2154 = vmatpush3.bf16.msra.mxu0 %v1364_v12  ;;  %2155 = vmatprep.mubr.msk.bf16.mxu0 %vm2655_vm1, %v2654_v14 }
 0x4d2   : > { %v1208_v15 = vsel %vm972_vm4, %v2346_v13, 0.0  ;;  %v1220_v16 = vpack.c.bf16 %v2346_v13, %v2346_v13  ;;  %2167 = vmatprep.subr.bf16.mxu0 %v2654_v14  ;;  %v1457_v22 = vsub.s32 %v1454_v11, %v3018_v20 }
 0x4d3   : > { %1209 = vadd.xlane.f32.xlu1 %v1208_v15  ;;  %v1425_v15 = vsub.s32 %v1422_v1, %v3018_v20  ;;  %v2031_v1 = vld [vmem:[#allocation12] ss:$0 sm:$0xff] }
 0x4d4   : > { %2150 = vmatmul.mubr.msk.bf16.vlgmr.msra.gmra.mxu1 %vm972_vm4, %v1220_v16 }
 0x4d5   : > { %v2348_v17 = vpop.eup %2347  ;;  %2163 = vmatprep.mubr.msk.bf16.mxu1 %vm2655_vm1, %v2654_v14 }
 0x4d6   : > { %v1211_v18 = vsel %vm972_vm4, %v2348_v17, 0.0  ;;  %v1221_v19 = vpack.c.bf16 %v2348_v17, %v2348_v17  ;;  %v2350_v23 = vpop.eup %2349 }
 0x4d7   : > { %1212 = vadd.xlane.f32.xlu1 %v1211_v18  ;;  %v1198_v25 = vmul.f32 0.0, %v2350_v23 }
 0x4d8   : > { %2156 = vmatmul.mubr.msk.bf16.vlgmr.msra.gmra.mxu0 %vm972_vm4, %v1221_v19 }
 0x4d9   : > { %2171 = vmatprep.mubr.msk.bf16.mxu0 %vm2655_vm1, %v2654_v14 }
 0x50b   : > { %v1204_v24 = vpop.xlane.xlu1 %1203 }
 0x50c   : > { %v1214_v26 = vadd.f32 %v1204_v24, %v1198_v25 }
 0x50e   : > { %2351 = vrcp.f32 %v1214_v26 }
 0x50f   : > { %2353 = vpow2.f32 %v1182_v36 }
 0x510   : > { %2355 = vpow2.f32 %v1180_v38 }
 0x511   : > { %2357 = vpow2.f32 %v1184_v39 }
 0x51b   : > { %v2352_v29 = vpop.eup %2351 }
 0x51c   : > { %v2354_v40 = vpop.eup %2353 }
 0x51d   : > { %v2356_v42 = vpop.eup %2355  ;;  %v1200_v43 = vmul.f32 0.0, %v2354_v40  ;;  %v2330_v40 = vld [vmem:[%s3156_s6] sm:$0xff]  }
 0x51e   : > { %v2358_v44 = vpop.eup %2357  ;;  %v1199_v47 = vmul.f32 0.0, %v2356_v42 }
 0x51f   : > { %v1201_v49 = vmul.f32 0.0, %v2358_v44 }
 0x543   : > { %v1262_v27 = vpop.f32.mrf.mxu1 }
 0x544   : > { %v1406_v28 = vadd.f32 %v1262_v27, %v1198_v25 }
 0x545   : > { %v2139_v30 = vpop.f32.mrf.mxu1 }
 0x546   : > { %v1411_v31 = vmul.f32 %v2352_v29, %v1406_v28 }
 0x547   : > { %v1265_v32 = vpop.f32.mrf.mxu1 }
 0x548   : > { %v2329_v32 = vld [vmem:[%s3156_s6 + $0x8] sm:$0xff]  }
 0x549   : > { %v2140_v33 = vpop.f32.mrf.mxu1  ;;  %2160 = vmatpush3.bf16.msra.mxu1 %v2329_v32 }
 0x54a   : > { %2161 = vmatprep.subr.bf16.mxu1 %v2654_v14 }
 0x54d   : > { %2162 = vmatpush3.bf16.msra.mxu1 %v2330_v40 }
 0x54e   : > { %2175 = vmatprep.subr.bf16.mxu1 %v2654_v14 }
 0x558   : > { %v1207_v45 = vpop.xlane.xlu0 %1206 }
 0x559   : > { %v1215_v50 = vadd.f32 %v1207_v45, %v1199_v47 }
 0x55c   : > { %v1210_v41 = vpop.xlane.xlu1 %1209 }
 0x55d   : > { %v1216_v46 = vadd.f32 %v1210_v41, %v1200_v43 }
 0x55f   : > { %2359 = vrcp.f32 %v1216_v46 }
 0x560   : > { %v1213_v48 = vpop.xlane.xlu1 %1212  ;;  %2361 = vrcp.f32 %v1215_v50 }
 0x561   : > { %v1217_v51 = vadd.f32 %v1213_v48, %v1201_v49 }
 0x563   : > { %2363 = vrcp.f32 %v1217_v51 }
 0x56c   : > { %v2360_v59 = vpop.eup %2359 }
 0x56d   : > { %v2362_v7 = vpop.eup %2361 }
 0x570   : > { %v2364_v10 = vpop.eup %2363 }
 0x590   : > { %v1308_v52 = vpop.f32.mrf.mxu0 }
 0x591   : > { %v1407_v2 = vadd.f32 %v1308_v52, %v1199_v47 }
 0x592   : > { %v2145_v53 = vpop.f32.mrf.mxu0 }
 0x593   : > { %v1413_v16 = vmul.f32 %v2362_v7, %v1407_v2 }
 0x594   : > { %v1311_v56 = vpop.f32.mrf.mxu0  ;;  %v1354_v57 = vpop.f32.mrf.mxu1 }
 0x595   : > { %v1408_v58 = vadd.f32 %v1354_v57, %v1200_v43 }
 0x596   : > { %v2146_v62 = vpop.f32.mrf.mxu0  ;;  %v2151_v63 = vpop.f32.mrf.mxu1 }
 0x597   : > { %v1415_v4 = vmul.f32 %v2360_v59, %v1408_v58 }
 0x598   : > { %v1357_v5 = vpop.f32.mrf.mxu1  ;;  %v1400_v6 = vpop.f32.mrf.mxu0 }
 0x599   : > { %v1418_v8 = vcombine.low %v1411_v31, %v1415_v4  ;;  %v1419_v3 = vcombine.high %v1411_v31, %v1415_v4  ;;  %v1409_v9 = vadd.f32 %v1400_v6, %v1201_v49 }
 0x59a   : > { %v2152_v12 = vpop.f32.mrf.mxu1  ;;  %v2157_v13 = vpop.f32.mrf.mxu0 }
 0x59b   : > { %v1417_v17 = vmul.f32 %v2364_v10, %v1409_v9  ;;  %v1426_v24 = vrot.slane %v1418_v8, %v1425_v15  ;;  %v1433_v25 = vrot.slane %v1419_v3, %v1425_v15 }
 0x59c   : > { %v1403_v18 = vpop.f32.mrf.mxu0 }
 0x59d   : > { %v1434_v19 = vcombine.low %v1413_v16, %v1417_v17  ;;  %v1435_v21 = vcombine.high %v1413_v16, %v1417_v17  ;;  %v2333_v16 = vld [vmem:[%s3162_s12 + $0x18] sm:$0xff]   ;;  %v2334_v17 = vld [vmem:[%s3162_s12 + $0x10] sm:$0xff]  }
 0x59e   : > { %v2158_v23 = vpop.f32.mrf.mxu0 }
 0x59f   : > { %v1442_v26 = vrot.slane %v1434_v19, %v1425_v15  ;;  %v1449_v27 = vrot.slane %v1435_v21, %v1425_v15  ;;  %v2035_v23 = vld [vmem:[#allocation13] ss:$0 sm:$0xff] }
 0x5a1   : > { %v1450_v28 = vcombine.low %v1426_v24, %v1442_v26  ;;  %v1451_v29 = vcombine.high %v1426_v24, %v1442_v26  ;;  %v1466_v30 = vcombine.low %v1433_v25, %v1449_v27  ;;  %v1467_v31 = vcombine.high %v1433_v25, %v1449_v27  ;;  %v2036_v25 = vld [vmem:[#allocation15] ss:$0 sm:$0xff] }
 0x5a3   : > { %v1458_v33 = vrot.slane %v1450_v28, %v1457_v22  ;;  %v1465_v34 = vrot.slane %v1451_v29, %v1457_v22  ;;  %v1474_v35 = vrot.slane %v1466_v30, %v1457_v22  ;;  %v1481_v36 = vrot.slane %v1467_v31, %v1457_v22  ;;  %v2335_v29 = vld [vmem:[%s3162_s12 + $0x8] sm:$0xff]   ;;  %v2336_v30 = vld [vmem:[%s3162_s12] sm:$0xff]  }
 0x5a5   : > { %v1486_v20 = vcombine.low %v1458_v33, %v1465_v34  ;;  %v2029_v37 = vcombine.high %v1458_v33, %v1465_v34  ;;  %v1502_v38 = vcombine.low %v1474_v35, %v1481_v36  ;;  %v2030_v39 = vcombine.high %v1474_v35, %v1481_v36 }
 0x5a7   : > { %v1493_v41 = vrot.slane %v1486_v20, %v1425_v15  ;;  %v1501_v42 = vrot.slane %v2029_v37, %v1425_v15  ;;  %v1509_v43 = vrot.slane %v1502_v38, %v1425_v15  ;;  %v1517_v44 = vrot.slane %v2030_v39, %v1425_v15  ;;  %v2331_v15 = vld [vmem:[%s3160_s10 + $0x8] sm:$0xff]  }
 0x5a8   : > { %2168 = vmatpush3.bf16.msra.mxu0 %v2331_v15 }
 0x5a9   : > { %v1519_v45 = vcombine.high %v1493_v41, %v1501_v42  ;;  %v1535_v46 = vcombine.high %v1509_v43, %v1517_v44  ;;  %v1518_v47 = vcombine.low %v1493_v41, %v1501_v42  ;;  %v1534_v48 = vcombine.low %v1509_v43, %v1517_v44  ;;  %2169 = vmatprep.subr.bf16.mxu0 %v2654_v14 }
 0x5ab   : > { %v1533_v49 = vrot.slane %v1519_v45, %v1457_v22  ;;  %v1549_v50 = vrot.slane %v1535_v46, %v1457_v22  ;;  %v1526_v51 = vrot.slane %v1518_v47, %v1457_v22  ;;  %v1542_v52 = vrot.slane %v1534_v48, %v1457_v22 }
 0x5ad   : > { %v1552_v53 = vcombine.low %v1533_v49, %v1549_v50  ;;  %v1551_v54 = vcombine.high %v1526_v51, %v1542_v52  ;;  %v1553_v55 = vcombine.high %v1533_v49, %v1549_v50  ;;  %v1550_v56 = vcombine.low %v1526_v51, %v1542_v52 }
 0x5af   : > { %1559 = vrot.lane.b32.xlu1 %v1552_v53, %s2661_s26  ;;  %1555 = vrot.lane.b32.xlu0 %v1551_v54, %s2662_s13  ;;  %s2664_s26 = smov [#allocation16]  }
 0x5b0   : > { %s2555_s13 = sshll.u32 %s2664_s26, 4  ;;  %s2556_s13 = int_to_ptr.vmem [resolvable:$false] %s2555_s13 }
 0x5b1   : > { %p2558_p4 = scmp.lt.s32.totalorder %s3103_s20, %s2556_s13 }
 0x5b3   : > { %1563 = vrot.lane.b32.xlu1 %v1553_v55, %s2663_s9  ;;  %s3200_s9 = sld [smem:[#allocation29_spill]] }
 0x5b9   : > { %v2038_v31 = vld [vmem:[%s3200_s9] ss:$0 sm:$0xff]  ;;  %s2557_s9 = scalar_lea.vmem %s2556_s13, 256 }
 0x5ba   : > { %p2559_p0 = scmp.lt.s32.totalorder %s2557_s9, %s2551_s22 }
 0x5bc   : > { %p2560_p6 = por %p2559_p0, %p2558_p4 }
 0x5be   : > { %p2561_p2 = pnand %p2560_p6, %p2554_p1 }
 0x621   : > { %v1560_v57 = vpop.permute.xlu1 %1559  ;;  %v1556_v58 = vpop.permute.xlu0 %1555 }
 0x622   : > { %v1566_v59 = vsel %vm972_vm4, %v1550_v56, %v1556_v58 }
 0x623   : > { %v1568_v61 = vsel %vm1567_vm6, %v1566_v59, %v1560_v57 }
 0x625   : > { %v1564_v60 = vpop.permute.xlu1 %1563 }
 0x626   : > { %v1570_v62 = vsel %vm1569_vm7, %v1568_v61, %v1564_v60 }
 0x627   : > { %v1571_v63 = vpack.c.bf16 %v1570_v62, %v1570_v62 }
 0x629   : > { %2164 = vmatmul.mubr.msk.bf16.vlgmr.msra.gmra.mxu1 %vm594_vm0, %v1571_v63 }
 0x62a   : > { %2183 = vmatprep.mubr.msk.bf16.mxu1 %vm2655_vm1, %v2654_v14  ;;  %2176 = vmatpush3.bf16.msra.mxu1 %v2333_v16 }
 0x62b   : > { %2177 = vmatprep.subr.bf16.mxu1 %v2654_v14 }
 0x62e   : > { %2178 = vmatpush3.bf16.msra.mxu1 %v2334_v17 }
 0x62f   : > { %2179 = vmatprep.subr.bf16.mxu1 %v2654_v14 }
 0x632   : > { %2180 = vmatpush3.bf16.msra.mxu1 %v2335_v29 }
 0x633   : > { %2181 = vmatprep.subr.bf16.mxu1 %v2654_v14  ;;  %v2037_v14 = vld [vmem:[%s3201_s21] ss:$0 sm:$0xff] }
 0x636   : > { %2182 = vmatpush3.bf16.msra.mxu1 %v2336_v30 }
 0x6e9   : > { %v1632_v2 = vpop.f32.mrf.mxu1 }
 0x6ea   : > { %v1633_v4 = vadd.f32 %v2031_v1, %v1632_v2 }
 0x6eb   : > { %v2165_v5 = vpop.f32.mrf.mxu1 }
 0x6ec   : > { %v1638_v6 = vadd.f32 %v1633_v4, %v2927_v0  ;;  %v2332_v0 = vld [vmem:[%s3160_s10] sm:$0xff]  }
 0x6ed   : > { %v1635_v7 = vpop.f32.mrf.mxu1  ;;  %2170 = vmatpush3.bf16.msra.mxu0 %v2332_v0 }
 0x6ee   : > { %v1641_v8 = vsel %vm594_vm0, %v1638_v6, 0.0  ;;  %v1676_v38 = vadd.f32 %v2037_v14, %v1638_v6 }
 0x6ef   : > { %1642 = vadd.xlane.f32.xlu0 %v1641_v8  ;;  %v2166_v3 = vpop.f32.mrf.mxu1 }
 0x778   : > { %v1643_v9 = vpop.xlane.xlu0 %1642 }
 0x779   : > { %v1644_v10 = vmul.f32 0.03125, %v1643_v9 }
 0x77b   : > { %v1645_v11 = vsub.f32 %v1638_v6, %v1644_v10 }
 0x77d   : > { %v1646_v12 = vmul.f32 %v1645_v11, %v1645_v11 }
 0x77f   : > { %v1647_v13 = vsel %vm594_vm0, %v1646_v12, 0.0 }
 0x780   : > { %1648 = vadd.xlane.f32.xlu1 %v1647_v13 }
 0x809   : > { %v1649_v18 = vpop.xlane.xlu1 %1648 }
 0x80a   : > { %v1650_v19 = vmul.f32 0.03125, %v1649_v18 }
 0x80c   : > { %v1651_v21 = vadd.f32 1e-05, %v1650_v19 }
 0x80e   : > { %2365 = vrsqrt.f32 %v1651_v21 }
 0x81b   : > { %v2366_v22 = vpop.eup %2365 }
 0x81c   : > { %v1653_v24 = vmul.f32 %v2366_v22, %v1645_v11 }
 0x81e   : > { %v1660_v26 = vmul.f32 %v2035_v23, %v1653_v24 }
 0x820   : > { %v1667_v27 = vadd.f32 %v2036_v25, %v1660_v26 }
 0x822   : > { %v1668_v28 = vpack.c.bf16 %v1667_v27, %v1667_v27 }
 0x824   : > { %2172 = vmatmul.mubr.msk.bf16.vlgmr.msra.gmra.mxu0 %vm594_vm0, %v1668_v28 }
 0x8e4   : > { %v1737_v32 = vpop.f32.mrf.mxu0 }
 0x8e5   : > { %v1738_v33 = vadd.f32 %v2038_v31, %v1737_v32 }
 0x8e6   : > { %v2173_v34 = vpop.f32.mrf.mxu0 }
 0x8e7   : > { %v1743_v35 = vmax.f32 %v1738_v33, 0.0 }
 0x8e8   : > { %v1740_v36 = vpop.f32.mrf.mxu0 }
 0x8e9   : > { %v1744_v20 = vpack.c.bf16 %v1743_v35, %v1743_v35 }
 0x8ea   : > { %v2174_v37 = vpop.f32.mrf.mxu0 }
 0x8eb   : > { %2184 = vmatmul.mubr.msk.bf16.vlgmr.msra.gmra.mxu1 %vm1777_vm8, %v1744_v20 }
 0x9ab   : > { %v1815_v39 = vpop.f32.mrf.mxu1 }
 0x9ac   : > { %v1821_v40 = vadd.f32 %v1815_v39, %v1676_v38 }
 0x9ad   : > { %v2185_v41 = vpop.f32.mrf.mxu1 }
 0x9ae   : > { %1822 = vst.msk [vmem:[%s581_s27] sm:$0xff] %vm594_vm0, %v1821_v40 }
 0x9af   : > { %v1818_v42 = vpop.f32.mrf.mxu1 }
 0x9b0   : > { %2564 = shalt.err (!%p2561_p2)
}
 0x9b1   : > { %s2565_s3 = scalar_lea.hbm %s3101_s25, 128  ;;  %s2569_s8 = scalar_lea.hbm %s3202_s2, 256 }
 0x9b2   : > { %p2566_p5 = scmp.ne.s32.totalorder %s3101_s25, %s2565_s3  ;;  %p2570_p12 = scmp.lt.s32.totalorder %s3101_s25, %s3202_s2 }
 0x9b3   : > { %p2571_p8 = scmp.lt.s32.totalorder %s2569_s8, %s2565_s3 }
 0x9b4   : > { %p2567_p10 = pnand %p2566_p5, %p2872_p9 }
 0x9b5   : > { %p2572_p3 = por %p2571_p8, %p2570_p12 }
 0x9b6   : > { %p2568_p13 = pneg %p2567_p10 }
 0x9b8   : > { %p2573_p7 = pnand %p2572_p3, %p2568_p13 }
 0x9ba   : > { %2576 = shalt.err (!%p2573_p7)
}
 0x9bb   : > { %2213 = dma.vmem_to_hbm [thread:$0]  (%p2872_p9), %s3103_s20, 128, %s3101_s25, %s1824_s16   ;;  %v2186_v43 = vpop.f32.mrf.mxu1 }
 0x9bc PF: > { %s1850_s27 = sand.u32 1, %s2623_s29   ;;  %p3203_p1 = scmp.ge.s32.totalorder %s2643_s18, 2 }
 0x9bd   : > { %s1851_s28 = scalar_lea.sflag [#allocation6], %s1850_s27 }
 0x9be   : > { %p2239_p4 = pnand %p3203_p1, %p2879_p11 }
 0x9c0   : > { %p2240_p0 = pneg %p2239_p4 }
 0x9c2   : > { %2618 = dma.done.wait (%p2240_p0), %s1851_s28, 128  }
 0x9c3   : > { %2620 = vsyncadd (%p2240_p0), %s1851_s28, 4294967168  ;;  %s33_s18 = sadd.s32 1, %s2643_s18   ;;  %s3204_s19 = sld [smem:[#allocation22_spill]] }
 0x9c4   : > { %p30_p6 = scmp.ge.s32.totalorder %s33_s18, 4   ;;  %s3205_s29 = smov %s2627_s30 }
 0x9c5   : > { %s3206_s30 = smov %s2631_s15  ;;  %s3207_s15 = smov %s2877_s14 }
 0x9c6   : > { %s3208_s16 = smov %s2639_s17  ;;  %32 = sbr.rel (!%p30_p6) target bundleno = 19 (0x13), region = 153 }
 0x9c9   : > { %s3209_s17 = smov %s3204_s19 }
 0x9cb   :  { %1856 = vsyncpa [#allocation5], 1 }
 0x9cc   :  { %1858 = vsyncpa [#allocation5 + $0x1], 1 }
 0x9cd   :  { %1859 = vsyncpa [#allocation8], 1 }
 0x9ce   :  { %1860 = vsyncpa [#allocation11], 1 }
 0x9cf   :  { %1861 = vsyncpa [#allocation14], 1 }
 0x9d0   :  { %1862 = vsyncpa [#allocation6], 1 }
 0x9d1   :  { %1864 = vsyncpa [#allocation6 + $0x1], 1 }

</bundles_post_ra>
